<compile_context>
chip_gen: v7x
topology: tpu7x:2x2x1
jax: 0.10.0
libtpu: 0.0.40
codegen_flags: <defaults>
</compile_context>

<pallas_src>
import functools
import math

import jax
import jax.numpy as jnp
from jax import lax
from jax.experimental import pallas as pl
from jax.experimental.pallas import tpu as pltpu

_PI = math.pi


def _pow(x, p):
    """Power with exact repeated-multiply path for non-negative integer exponents."""
    p = float(p)
    if p == 1.0:                         # alpha defaults to 1.0 -> no extra VPU pass
        return x
    if p.is_integer() and p >= 0:
        ip = int(p)
        if ip == 0:
            return jnp.ones_like(x)
        result = None
        base = x
        while ip:
            if ip & 1:
                result = base if result is None else result * base
            ip >>= 1
            if ip:
                base = base * base
        return result
    return jnp.power(x, p)


def _atan(z):
    """float32 arctan via Cephes-style range reduction + polynomial (basic ops only)."""
    # TODO(synk): torch.atan has no direct Mosaic lowering; this poly is accurate to ~1e-6.
    x = jnp.abs(z)
    t_hi = 2.414213562373095       # tan(3*pi/8)
    t_lo = 0.41421356237309503     # tan(pi/8)
    big = x > t_hi
    mid = jnp.logical_and(x > t_lo, jnp.logical_not(big))
    x_big = -1.0 / jnp.where(big, x, 1.0)
    x_mid = (x - 1.0) / (x + 1.0)
    xr = jnp.where(big, x_big, jnp.where(mid, x_mid, x))
    y0 = jnp.where(big, _PI / 2.0, jnp.where(mid, _PI / 4.0, 0.0))
    zz = xr * xr
    poly = ((((8.05374449538e-2 * zz - 1.38776856032e-1) * zz
              + 1.99777106478e-1) * zz - 3.33329491539e-1) * zz * xr) + xr
    res = y0 + poly
    return jnp.where(z < 0, -res, res)


def _ciou(gx1, gy1, gx2, gy2, px1, py1, px2, py2, eps=1e-7):
    """complete_box_iou on broadcastable coords; eps-guarded denominators so the
    degenerate/padded-box case stays finite (replaces the module's nan_to_num(0) —
    those entries get zeroed by the pad / inside-gt masks anyway).

    Divides are kept exact (not approx-reciprocal) on purpose: the same function is the
    reference path, and the top-k ordering feeding labels/foreground must match bit-for-bit.
    """
    area_g = (gx2 - gx1) * (gy2 - gy1)
    area_p = (px2 - px1) * (py2 - py1)
    iw = jnp.maximum(jnp.minimum(gx2, px2) - jnp.maximum(gx1, px1), 0.0)
    ih = jnp.maximum(jnp.minimum(gy2, py2) - jnp.maximum(gy1, py1), 0.0)
    inter = iw * ih
    union = area_g + area_p - inter
    iou = inter / (union + eps)
    cw = jnp.maximum(jnp.maximum(gx2, px2) - jnp.minimum(gx1, px1), 0.0)
    ch = jnp.maximum(jnp.maximum(gy2, py2) - jnp.minimum(gy1, py1), 0.0)
    diag2 = cw * cw + ch * ch + eps
    cdist2 = ((px1 + px2) * 0.5 - (gx1 + gx2) * 0.5) ** 2 + \
             ((py1 + py2) * 0.5 - (gy1 + gy2) * 0.5) ** 2
    diou = iou - cdist2 / diag2
    v = (4.0 / (_PI ** 2)) * (_atan((gx2 - gx1) / (gy2 - gy1 + eps)) -
                              _atan((px2 - px1) / (py2 - py1 + eps))) ** 2
    alpha_c = v / (1.0 - iou + v + eps)
    return diou - alpha_c * v


# ----------------------------------------------------------------------------- kernel
def _assign_kernel(ps_ref, pb_ref, cc_ref, gtr_ref,
                   lab_ref, bb_ref, sc_ref, fg_ref,
                   *, topk, alpha, beta, eps, num_classes, n_gt, num_cells):
    C, L, n = num_classes, num_cells, n_gt

    ps = ps_ref[0]                        # (C, L) class-major scores (MXU-native orientation)
    px1 = pb_ref[0, 0:1, :]               # (1, L)
    py1 = pb_ref[0, 1:2, :]
    px2 = pb_ref[0, 2:3, :]
    py2 = pb_ref[0, 3:4, :]
    cx = cc_ref[0:1, :]                   # (1, L)
    cy = cc_ref[1:2, :]
    gtr = gtr_ref[0]                      # (n, 8): [x1,y1,x2,y2,label,pad,0,0]
    gx1 = gtr[:, 0:1]; gy1 = gtr[:, 1:2]  # (n, 1)
    gx2 = gtr[:, 2:3]; gy2 = gtr[:, 3:4]
    lab_col = gtr[:, 4:5]                 # (n, 1) labels as float (exact small ints)
    labels_i = lab_col.astype(jnp.int32)  # (n, 1)
    pad = gtr[:, 5:6]                     # (n, 1)

    # 1) cell centers inside gt boxes, fused with the pad mask -> (n, L)
    min_ltrb = jnp.minimum(jnp.minimum(cx - gx1, cy - gy1),
                           jnp.minimum(gx2 - cx, gy2 - cy))
    gate = (min_ltrb > eps).astype(jnp.float32) * pad          # is_in_gts * pad

    # 2) complete IoU (gt x pred), clamp(0), mask -> (n, L)  (NaN-free by construction)
    ciou = _ciou(gx1, gy1, gx2, gy2, px1, py1, px2, py2)
    ious = jnp.maximum(ciou, 0.0) * gate

    # 3) gather each gt's class score via a one-hot MXU matmul at HIGHEST precision
    #    (error <= ~1 ulp, so the downstream top-k ordering is not perturbed) -> (n, L)
    cls_iota_nc = lax.broadcasted_iota(jnp.int32, (n, C), 1)
    onehot_nc = (labels_i == cls_iota_nc).astype(jnp.float32)                 # (n, C)
    bbox_cls = lax.dot_general(onehot_nc.astype(ps.dtype), ps,
                               (((1,), (0,)), ((), ())),
                               preferred_element_type=jnp.float32,
                               precision=lax.Precision.HIGHEST)               # (n, L)

    align = _pow(bbox_cls, alpha) * _pow(ious, beta)

    # 4) top-k cells per gt, one cross-lane reduction per iteration.
    #    Exact ties only happen at align == 0; encode those as a strictly decreasing
    #    negative index ramp so every value is unique and the lowest cell index wins,
    #    matching lax.top_k / torch.topk tie order (positive-value ties are measure-zero).
    idx_ramp = lax.broadcasted_iota(jnp.int32, (n, L), 1).astype(jnp.float32)
    work0 = jnp.where(align > 0.0, align, idx_ramp * (-1e-30))

    def topk_body(_, carry):
        work, acc = carry
        cur_max = jnp.max(work, axis=1, keepdims=True)        # single XLU lane-reduction
        sel = work == cur_max
        return jnp.where(sel, -jnp.inf, work), acc + sel.astype(jnp.float32)

    _, in_topk = lax.fori_loop(0, topk, topk_body,
                               (work0, jnp.zeros_like(align)), unroll=True)

    # padded gts and out-of-box cells are removed by the single fused gate
    mask_positive = in_topk * gate
    mps0 = jnp.sum(mask_positive, axis=0, keepdims=True)                      # (1, L)
    fg_pos = mps0 > 0.0     # (new_sum > 0) == (old_sum > 0): the conflict-resolution step
                            # never empties a column, so the second sum-reduction is dropped.

    # 5) resolve cells claimed by several gts with the max-IoU gt
    is_max_iou = (ious == jnp.max(ious, axis=0, keepdims=True)).astype(jnp.float32)
    mask_positive = jnp.where(mps0 > 1.0, is_max_iou, mask_positive)

    # 6) per-cell assigned gt = first argmax over gt axis (all-zero column -> gt 0,
    #    matching torch argmax); exact masked-sum gather over the n gt rows (bit-exact).
    iota_n = lax.broadcasted_iota(jnp.int32, (n, L), 0)
    agi = jnp.min(jnp.where(mask_positive > 0.5, iota_n, n), axis=0, keepdims=True)
    agi = jnp.where(agi == n, 0, agi)                                          # (1, L)
    gt_onehot = (iota_n == agi).astype(jnp.float32)                            # (n, L)

    def gather_row(col):          # (n, 1) -> (1, L); exactly one nonzero term per column
        return jnp.sum(gt_onehot * col, axis=0, keepdims=True)

    bb_ref[0] = jnp.concatenate([gather_row(gx1), gather_row(gy1),
                                 gather_row(gx2), gather_row(gy2)], axis=0)    # (4, L)

    lab_f = jnp.where(fg_pos, gather_row(lab_col), float(num_classes))
    lab_ref[0] = lab_f.astype(jnp.int32)                                       # (1, L)

    # 7) rescaled alignment metric; assigned_scores built on the MXU.
    #    Background cells fall out automatically because final == 0 there.
    align_m = align * mask_positive
    max_m = jnp.max(align_m, axis=1, keepdims=True)                            # (n, 1)
    max_i = jnp.max(ious * mask_positive, axis=1, keepdims=True)               # (n, 1)
    scale = max_i * pl.reciprocal(max_m + eps, approx=True)                    # EUP slot
    final = jnp.max(align_m * scale, axis=0, keepdims=True)                    # (1, L)

    onehot_cn = onehot_nc.T                                                    # (C, n) tiny
    sc_ref[0] = lax.dot_general(onehot_cn, gt_onehot * final,
                                (((1,), (0,)), ((), ())),
                                preferred_element_type=jnp.float32,
                                precision=lax.Precision.HIGHEST)               # (C, L)

    fg_ref[0] = fg_pos.astype(jnp.int32)


# ----------------------------------------------------------------------------- wrapper
def _vmem_limit_bytes(L, C, n, score_itemsize):
    """Footprint-based VMEM limit, clamped to 3/4 of the chip's VMEM (v7x = 64 MiB/TC)."""
    pad128 = lambda v: -(-v // 128) * 128
    pad8 = lambda v: -(-v // 8) * 8
    f32 = 4
    Lp, Cp, np_ = pad128(L), pad8(C), pad8(n)
    inputs = 2 * (Cp * Lp * score_itemsize + pad8(4) * Lp * f32
                  + pad8(2) * Lp * f32 + np_ * 128 * f32)          # double-buffered
    outputs = 2 * (pad8(1) * Lp * 4 + pad8(4) * Lp * f32
                   + Cp * Lp * f32 + pad8(1) * Lp * 4)             # double-buffered
    temps = f32 * (16 * np_ * Lp + 2 * Cp * Lp)                    # live (n,L)/(C,L) temporaries
    need = inputs + outputs + temps + (4 << 20)                    # Mosaic internal scratch slack
    try:
        cap = int(pltpu.get_tpu_info().vmem_capacity_bytes)
    except Exception:
        cap = 64 << 20                                             # conservative (v7x per-TC)
    return int(min(max(need, 16 << 20), (cap * 3) // 4))


def task_aligned_assign_lane_major(pred_scores, pred_bboxes, cell_centers_scaled,
                                   gt_labels, gt_bboxes, pad_gt_mask,
                                   topk=13, alpha=1.0, beta=6.0, eps=1e-9,
                                   num_classes=None, cast_scores_to_bf16=False):
    """Returns lane-major outputs: labels (B,L) i32, bboxes (B,4,L), scores (B,C,L), fg (B,L) bool.
    Use this variant directly if the consumer can take class-/coord-major tensors (saves a
    full HBM round-trip of the score tensor — relevant on v5e)."""
    B, L, C = pred_scores.shape
    n = gt_bboxes.shape[1]
    if num_classes is None:
        num_classes = C
    assert topk <= L, "topk must not exceed the number of cells"

    if n == 0:  # mirror the module's empty-gt early exit
        return (jnp.full((B, L), num_classes, jnp.int32),
                jnp.zeros((B, 4, L), jnp.float32),
                jnp.zeros((B, C, L), jnp.float32),
                jnp.zeros((B, L), bool))

    score_dtype = jnp.bfloat16 if cast_scores_to_bf16 else jnp.float32
    # class-major scores: one XLA transpose up front instead of a per-grid-step XLU
    # transpose + 128/C lane padding of the largest double-buffered block.
    ps_cl = jnp.transpose(pred_scores, (0, 2, 1)).astype(score_dtype)         # (B, C, L)
    pb_t = jnp.transpose(pred_bboxes.astype(jnp.float32), (0, 2, 1))          # (B, 4, L)
    cc_t = jnp.transpose(cell_centers_scaled.astype(jnp.float32), (1, 0))     # (2, L)

    # single packed gt block: [x1, y1, x2, y2, label, pad, 0, 0]  (no transposed copy needed)
    gt_rows = jnp.concatenate([gt_bboxes.astype(jnp.float32),
                               gt_labels.astype(jnp.float32),
                               pad_gt_mask.astype(jnp.float32),
                               jnp.zeros((B, n, 2), jnp.float32)], axis=-1)   # (B, n, 8)

    kern = functools.partial(_assign_kernel, topk=topk, alpha=alpha, beta=beta,
                             eps=eps, num_classes=num_classes, n_gt=n, num_cells=L)

    out_shapes = (
        jax.ShapeDtypeStruct((B, 1, L), jnp.int32),    # assigned labels
        jax.ShapeDtypeStruct((B, 4, L), jnp.float32),  # assigned bboxes (coord-major)
        jax.ShapeDtypeStruct((B, C, L), jnp.float32),  # assigned scores (class-major)
        jax.ShapeDtypeStruct((B, 1, L), jnp.int32),    # foreground mask
    )

    flops = int(B * (4 * n * C * L + (60 + 3 * topk) * n * L + 12 * n * L + 4 * C * L))
    bytes_accessed = int(ps_cl.dtype.itemsize * B * C * L
                         + 4 * (B * 4 * L + 2 * L + B * n * 8
                                + B * L + B * 4 * L + B * C * L + B * L))

    lab, bb_t, sc_t, fg = pl.pallas_call(
        kern,
        out_shape=out_shapes,
        grid=(B,),
        in_specs=[
            pl.BlockSpec((1, C, L), lambda b: (b, 0, 0)),
            pl.BlockSpec((1, 4, L), lambda b: (b, 0, 0)),
            pl.BlockSpec((2, L), lambda b: (0, 0)),
            pl.BlockSpec((1, n, 8), lambda b: (b, 0, 0)),
        ],
        out_specs=(
            pl.BlockSpec((1, 1, L), lambda b: (b, 0, 0)),
            pl.BlockSpec((1, 4, L), lambda b: (b, 0, 0)),
            pl.BlockSpec((1, C, L), lambda b: (b, 0, 0)),
            pl.BlockSpec((1, 1, L), lambda b: (b, 0, 0)),
        ),
        compiler_params=pltpu.CompilerParams(
            # batch axis is sharded across TensorCores on v7x; for odd/tiny B at
            # production sizes add a second parallel axis (see L-chunking TODO above).
            dimension_semantics=("parallel",),
            vmem_limit_bytes=_vmem_limit_bytes(L, C, n, ps_cl.dtype.itemsize),
        ),
        cost_estimate=pl.CostEstimate(flops=flops, transcendentals=int(B * n),
                                      bytes_accessed=bytes_accessed),
    )(ps_cl, pb_t, cc_t, gt_rows)

    return lab[:, 0, :], bb_t, sc_t, fg[:, 0, :].astype(bool)


def task_aligned_assign(pred_scores, pred_bboxes, cell_centers_scaled,
                        gt_labels, gt_bboxes, pad_gt_mask,
                        topk=13, alpha=1.0, beta=6.0, eps=1e-9, num_classes=None,
                        cast_scores_to_bf16=False):
    """PyTorch-layout outputs: labels (B,L), bboxes (B,L,4), scores (B,L,C), fg (B,L)."""
    lab, bb_cl, sc_cl, fg = task_aligned_assign_lane_major(
        pred_scores, pred_bboxes, cell_centers_scaled,
        gt_labels, gt_bboxes, pad_gt_mask,
        topk=topk, alpha=alpha, beta=beta, eps=eps, num_classes=num_classes,
        cast_scores_to_bf16=cast_scores_to_bf16)
    return (lab,
            jnp.transpose(bb_cl, (0, 2, 1)),
            jnp.transpose(sc_cl, (0, 2, 1)),
            fg)


# ----------------------------------------------------------------------------- JAX reference
def _reference(pred_scores, pred_bboxes, cell_centers, gt_labels, gt_bboxes, pad_gt_mask,
               topk=13, alpha=1.0, beta=6.0, eps=1e-9, num_classes=None):
    B, L, C = pred_scores.shape
    n = gt_bboxes.shape[1]
    if num_classes is None:
        num_classes = C
    bg = num_classes

    x = cell_centers[None, None, :, 0]
    y = cell_centers[None, None, :, 1]
    gx1, gy1, gx2, gy2 = (gt_bboxes[:, :, i:i + 1] for i in range(4))      # (B,n,1)
    px1, py1, px2, py2 = (pred_bboxes[:, None, :, i] for i in range(4))    # (B,1,L)

    mn = jnp.minimum(jnp.minimum(x - gx1, y - gy1), jnp.minimum(gx2 - x, gy2 - y))
    is_in_gts = (mn > eps).astype(jnp.float32)

    ciou = _ciou(gx1, gy1, gx2, gy2, px1, py1, px2, py2)
    ious = jnp.maximum(ciou, 0.0) * pad_gt_mask * is_in_gts

    ps_t = jnp.transpose(pred_scores, (0, 2, 1))                           # (B,C,L)
    labels = gt_labels[..., 0].astype(jnp.int32)                           # (B,n)
    idx = jnp.broadcast_to(labels[:, :, None], (B, n, L))
    bbox_cls = jnp.take_along_axis(ps_t, idx, axis=1)                      # (B,n,L)

    align = _pow(bbox_cls, alpha) * _pow(ious, beta)

    _, topk_idxs = lax.top_k(align, topk)
    tmask = pad_gt_mask.astype(bool)
    topk_idxs = jnp.where(tmask, topk_idxs, 0)
    cnt = jnp.sum(jax.nn.one_hot(topk_idxs, L, dtype=jnp.int32), axis=-2)
    is_in_topk = jnp.where(cnt > 1, 0, cnt).astype(jnp.float32)

    mask_positive = is_in_topk * is_in_gts * pad_gt_mask
    mps = jnp.sum(mask_positive, axis=1)
    is_max_iou = (ious == jnp.max(ious, axis=1, keepdims=True)).astype(jnp.float32)
    mask_positive = jnp.where(mps[:, None, :] > 1, is_max_iou, mask_positive)
    mps = jnp.sum(mask_positive, axis=1)

    agi = jnp.argmax(mask_positive, axis=1)                                # (B,L)
    flat = agi + jnp.arange(B)[:, None] * n
    assigned_labels = jnp.take(labels.reshape(-1), flat)
    assigned_labels = jnp.where(mps > 0, assigned_labels, bg)
    assigned_bboxes = jnp.take(gt_bboxes.reshape(-1, 4), flat, axis=0)
    assigned_scores = jax.nn.one_hot(assigned_labels, num_classes + 1,
                                     dtype=jnp.float32)[..., :bg]

    am = align * mask_positive
    max_m = jnp.max(am, axis=-1, keepdims=True)
    max_i = jnp.max(ious * mask_positive, axis=-1, keepdims=True)
    am = am / (max_m + eps) * max_i
    final = jnp.max(am, axis=1)[..., None]
    assigned_scores = assigned_scores * final
    return assigned_labels, assigned_bboxes, assigned_scores, mps > 0


# ----------------------------------------------------------------------------- main
if __name__ == "__main__":
    B, n, C, topk = 2, 8, 16, 13
    gh, gw, stride = 16, 16, 8.0
    L = gh * gw
    img = gh * stride

    key = jax.random.PRNGKey(0)
    ks = jax.random.split(key, 8)

    yy, xx = jnp.meshgrid(jnp.arange(gh, dtype=jnp.float32),
                          jnp.arange(gw, dtype=jnp.float32), indexing="ij")
    cell_centers = jnp.stack([(xx.reshape(-1) + 0.5) * stride,
                              (yy.reshape(-1) + 0.5) * stride], axis=-1)   # (L, 2)

    gcx = jax.random.uniform(ks[0], (B, n, 1), minval=0.2 * img, maxval=0.8 * img)
    gcy = jax.random.uniform(ks[1], (B, n, 1), minval=0.2 * img, maxval=0.8 * img)
    gwh = jax.random.uniform(ks[2], (B, n, 2), minval=20.0, maxval=70.0)
    gt_bboxes = jnp.concatenate([gcx - gwh[..., 0:1] / 2, gcy - gwh[..., 1:2] / 2,
                                 gcx + gwh[..., 0:1] / 2, gcy + gwh[..., 1:2] / 2], axis=-1)
    pad_gt_mask = jnp.broadcast_to((jnp.arange(n) < 5).astype(jnp.float32)[None, :, None],
                                   (B, n, 1))
    gt_bboxes = gt_bboxes * pad_gt_mask
    gt_labels = jax.random.randint(ks[3], (B, n, 1), 0, C) * pad_gt_mask.astype(jnp.int32)

    pcxy = cell_centers[None, :, :] + jax.random.uniform(ks[4], (B, L, 2),
                                                         minval=-6.0, maxval=6.0)
    pwh = jax.random.uniform(ks[5], (B, L, 2), minval=10.0, maxval=60.0)
    pred_bboxes = jnp.concatenate([pcxy - pwh / 2, pcxy + pwh / 2], axis=-1)
    pred_scores = jax.random.uniform(ks[6], (B, L, C))

    out = task_aligned_assign(pred_scores, pred_bboxes, cell_centers,
                              gt_labels, gt_bboxes, pad_gt_mask,
                              topk=topk, num_classes=C)
    out = jax.block_until_ready(out)
    lab_k, bb_k, sc_k, fg_k = out

    lab_r, bb_r, sc_r, fg_r = _reference(pred_scores, pred_bboxes, cell_centers,
                                         gt_labels, gt_bboxes, pad_gt_mask,
                                         topk=topk, num_classes=C)

    assert lab_k.shape == (B, L) and bb_k.shape == (B, L, 4)
    assert sc_k.shape == (B, L, C) and fg_k.shape == (B, L) and fg_k.dtype == jnp.bool_
    assert bool(jnp.all(lab_k == lab_r)), "assigned_labels mismatch"
    assert bool(jnp.all(fg_k == fg_r)), "foreground_mask mismatch"
    # bbox gather is now an exact masked-sum select over the n gt rows -> tight tolerance.
    assert bool(jnp.allclose(bb_k, bb_r, atol=1e-5, rtol=0.0)), "assigned_bboxes mismatch"
    # scores use an approximate (EUP) reciprocal in the rescale + HIGHEST-precision MXU matmul.
    assert bool(jnp.allclose(sc_k, sc_r, atol=5e-3, rtol=5e-3)), "assigned_scores mismatch"

    print("KERNEL_OK")
</pallas_src>

<mosaic_0001>
module attributes {stable_mosaic.version = 11 : i64} {
  func.func @_assign_kernel(%arg0: i32, %arg1: memref<1x16x256xf32, #tpu.memory_space<vmem>>, %arg2: memref<1x4x256xf32, #tpu.memory_space<vmem>>, %arg3: memref<2x256xf32, #tpu.memory_space<vmem>>, %arg4: memref<1x8x8xf32, #tpu.memory_space<vmem>>, %arg5: memref<1x1x256xi32, #tpu.memory_space<vmem>>, %arg6: memref<1x4x256xf32, #tpu.memory_space<vmem>>, %arg7: memref<1x16x256xf32, #tpu.memory_space<vmem>>, %arg8: memref<1x1x256xi32, #tpu.memory_space<vmem>>) attributes {dimension_semantics = [#tpu.dimension_semantics<parallel>], iteration_bounds = array<i64: 2>, scalar_prefetch = 0 : i64, scratch_operands = 0 : i64, tpu.core_type = #tpu.core_type<tc>, window_params = [{transform_indices = @transform_0, window_bounds = array<i64: 1, 16, 256>}, {transform_indices = @transform_1, window_bounds = array<i64: 1, 4, 256>}, {pipeline_mode = #tpu.pipeline_mode<synchronous>, transform_indices = @transform_2, window_bounds = array<i64: 2, 256>}, {transform_indices = @transform_3, window_bounds = array<i64: 1, 8, 8>}, {transform_indices = @transform_4, window_bounds = array<i64: 1, 1, 256>}, {transform_indices = @transform_5, window_bounds = array<i64: 1, 4, 256>}, {transform_indices = @transform_6, window_bounds = array<i64: 1, 16, 256>}, {transform_indices = @transform_7, window_bounds = array<i64: 1, 1, 256>}]} {
    %c0 = arith.constant 0 : index
    %c0_0 = arith.constant 0 : index
    %c0_1 = arith.constant 0 : index
    %0 = vector.load %arg1[%c0, %c0_0, %c0_1] : memref<1x16x256xf32, #tpu.memory_space<vmem>>, vector<1x16x256xf32>
    %1 = vector.shape_cast %0 : vector<1x16x256xf32> to vector<16x256xf32>
    %c0_2 = arith.constant 0 : index
    %c0_3 = arith.constant 0 : index
    %c0_4 = arith.constant 0 : index
    %2 = vector.load %arg2[%c0_2, %c0_3, %c0_4] : memref<1x4x256xf32, #tpu.memory_space<vmem>>, vector<1x1x256xf32>
    %3 = vector.shape_cast %2 : vector<1x1x256xf32> to vector<1x256xf32>
    %c0_5 = arith.constant 0 : index
    %c1 = arith.constant 1 : index
    %c0_6 = arith.constant 0 : index
    %4 = vector.load %arg2[%c0_5, %c1, %c0_6] : memref<1x4x256xf32, #tpu.memory_space<vmem>>, vector<1x1x256xf32>
    %5 = vector.shape_cast %4 : vector<1x1x256xf32> to vector<1x256xf32>
    %c0_7 = arith.constant 0 : index
    %c2 = arith.constant 2 : index
    %c0_8 = arith.constant 0 : index
    %6 = vector.load %arg2[%c0_7, %c2, %c0_8] : memref<1x4x256xf32, #tpu.memory_space<vmem>>, vector<1x1x256xf32>
    %7 = vector.shape_cast %6 : vector<1x1x256xf32> to vector<1x256xf32>
    %c0_9 = arith.constant 0 : index
    %c3 = arith.constant 3 : index
    %c0_10 = arith.constant 0 : index
    %8 = vector.load %arg2[%c0_9, %c3, %c0_10] : memref<1x4x256xf32, #tpu.memory_space<vmem>>, vector<1x1x256xf32>
    %9 = vector.shape_cast %8 : vector<1x1x256xf32> to vector<1x256xf32>
    %c0_11 = arith.constant 0 : index
    %c0_12 = arith.constant 0 : index
    %10 = vector.load %arg3[%c0_11, %c0_12] : memref<2x256xf32, #tpu.memory_space<vmem>>, vector<1x256xf32>
    %c1_13 = arith.constant 1 : index
    %c0_14 = arith.constant 0 : index
    %11 = vector.load %arg3[%c1_13, %c0_14] : memref<2x256xf32, #tpu.memory_space<vmem>>, vector<1x256xf32>
    %c0_15 = arith.constant 0 : index
    %c0_16 = arith.constant 0 : index
    %c0_17 = arith.constant 0 : index
    %12 = vector.load %arg4[%c0_15, %c0_16, %c0_17] : memref<1x8x8xf32, #tpu.memory_space<vmem>>, vector<1x8x8xf32>
    %13 = vector.shape_cast %12 : vector<1x8x8xf32> to vector<8x8xf32>
    %14 = vector.extract_strided_slice %13 {offsets = [0, 0], sizes = [8, 1], strides = [1, 1]} : vector<8x8xf32> to vector<8x1xf32>
    %15 = vector.extract_strided_slice %13 {offsets = [0, 1], sizes = [8, 1], strides = [1, 1]} : vector<8x8xf32> to vector<8x1xf32>
    %16 = vector.extract_strided_slice %13 {offsets = [0, 2], sizes = [8, 1], strides = [1, 1]} : vector<8x8xf32> to vector<8x1xf32>
    %17 = vector.extract_strided_slice %13 {offsets = [0, 3], sizes = [8, 1], strides = [1, 1]} : vector<8x8xf32> to vector<8x1xf32>
    %18 = vector.extract_strided_slice %13 {offsets = [0, 4], sizes = [8, 1], strides = [1, 1]} : vector<8x8xf32> to vector<8x1xf32>
    %19 = arith.fptosi %18 : vector<8x1xf32> to vector<8x1xi32>
    %20 = vector.extract_strided_slice %13 {offsets = [0, 5], sizes = [8, 1], strides = [1, 1]} : vector<8x8xf32> to vector<8x1xf32>
    %21 = vector.broadcast %10 : vector<1x256xf32> to vector<8x256xf32>
    %22 = vector.broadcast %14 : vector<8x1xf32> to vector<8x256xf32>
    %23 = arith.subf %21, %22 : vector<8x256xf32>
    %24 = vector.broadcast %11 : vector<1x256xf32> to vector<8x256xf32>
    %25 = vector.broadcast %15 : vector<8x1xf32> to vector<8x256xf32>
    %26 = arith.subf %24, %25 : vector<8x256xf32>
    %27 = arith.minimumf %23, %26 : vector<8x256xf32>
    %28 = vector.broadcast %16 : vector<8x1xf32> to vector<8x256xf32>
    %29 = vector.broadcast %10 : vector<1x256xf32> to vector<8x256xf32>
    %30 = arith.subf %28, %29 : vector<8x256xf32>
    %31 = vector.broadcast %17 : vector<8x1xf32> to vector<8x256xf32>
    %32 = vector.broadcast %11 : vector<1x256xf32> to vector<8x256xf32>
    %33 = arith.subf %31, %32 : vector<8x256xf32>
    %34 = arith.minimumf %30, %33 : vector<8x256xf32>
    %35 = arith.minimumf %27, %34 : vector<8x256xf32>
    %cst = arith.constant 9.99999971E-10 : f32
    %36 = vector.broadcast %cst : f32 to vector<8x256xf32>
    %37 = arith.cmpf ogt, %35, %36 : vector<8x256xf32>
    %38 = arith.extui %37 : vector<8x256xi1> to vector<8x256xi32>
    %39 = arith.sitofp %38 : vector<8x256xi32> to vector<8x256xf32>
    %40 = vector.broadcast %20 : vector<8x1xf32> to vector<8x256xf32>
    %41 = arith.mulf %39, %40 : vector<8x256xf32>
    %42 = arith.subf %16, %14 : vector<8x1xf32>
    %43 = arith.subf %17, %15 : vector<8x1xf32>
    %44 = arith.mulf %42, %43 : vector<8x1xf32>
    %45 = arith.subf %7, %3 : vector<1x256xf32>
    %46 = arith.subf %9, %5 : vector<1x256xf32>
    %47 = arith.mulf %45, %46 : vector<1x256xf32>
    %48 = vector.broadcast %16 : vector<8x1xf32> to vector<8x256xf32>
    %49 = vector.broadcast %7 : vector<1x256xf32> to vector<8x256xf32>
    %50 = arith.minimumf %48, %49 : vector<8x256xf32>
    %51 = vector.broadcast %14 : vector<8x1xf32> to vector<8x256xf32>
    %52 = vector.broadcast %3 : vector<1x256xf32> to vector<8x256xf32>
    %53 = arith.maximumf %51, %52 : vector<8x256xf32>
    %54 = arith.subf %50, %53 : vector<8x256xf32>
    %cst_18 = arith.constant 0.000000e+00 : f32
    %55 = vector.broadcast %cst_18 : f32 to vector<8x256xf32>
    %56 = arith.maximumf %54, %55 : vector<8x256xf32>
    %57 = vector.broadcast %17 : vector<8x1xf32> to vector<8x256xf32>
    %58 = vector.broadcast %9 : vector<1x256xf32> to vector<8x256xf32>
    %59 = arith.minimumf %57, %58 : vector<8x256xf32>
    %60 = vector.broadcast %15 : vector<8x1xf32> to vector<8x256xf32>
    %61 = vector.broadcast %5 : vector<1x256xf32> to vector<8x256xf32>
    %62 = arith.maximumf %60, %61 : vector<8x256xf32>
    %63 = arith.subf %59, %62 : vector<8x256xf32>
    %cst_19 = arith.constant 0.000000e+00 : f32
    %64 = vector.broadcast %cst_19 : f32 to vector<8x256xf32>
    %65 = arith.maximumf %63, %64 : vector<8x256xf32>
    %66 = arith.mulf %56, %65 : vector<8x256xf32>
    %67 = vector.broadcast %44 : vector<8x1xf32> to vector<8x256xf32>
    %68 = vector.broadcast %47 : vector<1x256xf32> to vector<8x256xf32>
    %69 = arith.addf %67, %68 : vector<8x256xf32>
    %70 = arith.subf %69, %66 : vector<8x256xf32>
    %cst_20 = arith.constant 1.000000e-07 : f32
    %71 = vector.broadcast %cst_20 : f32 to vector<8x256xf32>
    %72 = arith.addf %70, %71 : vector<8x256xf32>
    %73 = arith.divf %66, %72 : vector<8x256xf32>
    %74 = vector.broadcast %16 : vector<8x1xf32> to vector<8x256xf32>
    %75 = vector.broadcast %7 : vector<1x256xf32> to vector<8x256xf32>
    %76 = arith.maximumf %74, %75 : vector<8x256xf32>
    %77 = vector.broadcast %14 : vector<8x1xf32> to vector<8x256xf32>
    %78 = vector.broadcast %3 : vector<1x256xf32> to vector<8x256xf32>
    %79 = arith.minimumf %77, %78 : vector<8x256xf32>
    %80 = arith.subf %76, %79 : vector<8x256xf32>
    %cst_21 = arith.constant 0.000000e+00 : f32
    %81 = vector.broadcast %cst_21 : f32 to vector<8x256xf32>
    %82 = arith.maximumf %80, %81 : vector<8x256xf32>
    %83 = vector.broadcast %17 : vector<8x1xf32> to vector<8x256xf32>
    %84 = vector.broadcast %9 : vector<1x256xf32> to vector<8x256xf32>
    %85 = arith.maximumf %83, %84 : vector<8x256xf32>
    %86 = vector.broadcast %15 : vector<8x1xf32> to vector<8x256xf32>
    %87 = vector.broadcast %5 : vector<1x256xf32> to vector<8x256xf32>
    %88 = arith.minimumf %86, %87 : vector<8x256xf32>
    %89 = arith.subf %85, %88 : vector<8x256xf32>
    %cst_22 = arith.constant 0.000000e+00 : f32
    %90 = vector.broadcast %cst_22 : f32 to vector<8x256xf32>
    %91 = arith.maximumf %89, %90 : vector<8x256xf32>
    %92 = arith.mulf %82, %82 : vector<8x256xf32>
    %93 = arith.mulf %91, %91 : vector<8x256xf32>
    %94 = arith.addf %92, %93 : vector<8x256xf32>
    %cst_23 = arith.constant 1.000000e-07 : f32
    %95 = vector.broadcast %cst_23 : f32 to vector<8x256xf32>
    %96 = arith.addf %94, %95 : vector<8x256xf32>
    %97 = arith.addf %3, %7 : vector<1x256xf32>
    %cst_24 = arith.constant 5.000000e-01 : f32
    %98 = vector.broadcast %cst_24 : f32 to vector<1x256xf32>
    %99 = arith.mulf %97, %98 : vector<1x256xf32>
    %100 = arith.addf %14, %16 : vector<8x1xf32>
    %cst_25 = arith.constant 5.000000e-01 : f32
    %101 = vector.broadcast %cst_25 : f32 to vector<8x1xf32>
    %102 = arith.mulf %100, %101 : vector<8x1xf32>
    %103 = vector.broadcast %99 : vector<1x256xf32> to vector<8x256xf32>
    %104 = vector.broadcast %102 : vector<8x1xf32> to vector<8x256xf32>
    %105 = arith.subf %103, %104 : vector<8x256xf32>
    %106 = arith.mulf %105, %105 : vector<8x256xf32>
    %107 = arith.addf %5, %9 : vector<1x256xf32>
    %cst_26 = arith.constant 5.000000e-01 : f32
    %108 = vector.broadcast %cst_26 : f32 to vector<1x256xf32>
    %109 = arith.mulf %107, %108 : vector<1x256xf32>
    %110 = arith.addf %15, %17 : vector<8x1xf32>
    %cst_27 = arith.constant 5.000000e-01 : f32
    %111 = vector.broadcast %cst_27 : f32 to vector<8x1xf32>
    %112 = arith.mulf %110, %111 : vector<8x1xf32>
    %113 = vector.broadcast %109 : vector<1x256xf32> to vector<8x256xf32>
    %114 = vector.broadcast %112 : vector<8x1xf32> to vector<8x256xf32>
    %115 = arith.subf %113, %114 : vector<8x256xf32>
    %116 = arith.mulf %115, %115 : vector<8x256xf32>
    %117 = arith.addf %106, %116 : vector<8x256xf32>
    %118 = arith.divf %117, %96 : vector<8x256xf32>
    %119 = arith.subf %73, %118 : vector<8x256xf32>
    %120 = arith.subf %16, %14 : vector<8x1xf32>
    %121 = arith.subf %17, %15 : vector<8x1xf32>
    %cst_28 = arith.constant 1.000000e-07 : f32
    %122 = vector.broadcast %cst_28 : f32 to vector<8x1xf32>
    %123 = arith.addf %121, %122 : vector<8x1xf32>
    %124 = arith.divf %120, %123 : vector<8x1xf32>
    %125 = math.absf %124 : vector<8x1xf32>
    %cst_29 = arith.constant 2.41421366 : f32
    %126 = vector.broadcast %cst_29 : f32 to vector<8x1xf32>
    %127 = arith.cmpf ogt, %125, %126 : vector<8x1xf32>
    %cst_30 = arith.constant 0.414213568 : f32
    %128 = vector.broadcast %cst_30 : f32 to vector<8x1xf32>
    %129 = arith.cmpf ogt, %125, %128 : vector<8x1xf32>
    %cst_31 = arith.constant dense<true> : vector<8x1xi1>
    %130 = arith.xori %127, %cst_31 : vector<8x1xi1>
    %131 = arith.andi %129, %130 : vector<8x1xi1>
    %cst_32 = arith.constant 1.000000e+00 : f32
    %132 = vector.broadcast %cst_32 : f32 to vector<8x1xf32>
    %133 = arith.select %127, %125, %132 : vector<8x1xi1>, vector<8x1xf32>
    %cst_33 = arith.constant -1.000000e+00 : f32
    %134 = vector.broadcast %cst_33 : f32 to vector<8x1xf32>
    %135 = arith.divf %134, %133 : vector<8x1xf32>
    %cst_34 = arith.constant 1.000000e+00 : f32
    %136 = vector.broadcast %cst_34 : f32 to vector<8x1xf32>
    %137 = arith.subf %125, %136 : vector<8x1xf32>
    %cst_35 = arith.constant 1.000000e+00 : f32
    %138 = vector.broadcast %cst_35 : f32 to vector<8x1xf32>
    %139 = arith.addf %125, %138 : vector<8x1xf32>
    %140 = arith.divf %137, %139 : vector<8x1xf32>
    %141 = arith.select %131, %140, %125 : vector<8x1xi1>, vector<8x1xf32>
    %142 = arith.select %127, %135, %141 : vector<8x1xi1>, vector<8x1xf32>
    %cst_36 = arith.constant 0.785398185 : f32
    %cst_37 = arith.constant 0.000000e+00 : f32
    %143 = vector.broadcast %cst_36 : f32 to vector<8x1xf32>
    %144 = vector.broadcast %cst_37 : f32 to vector<8x1xf32>
    %145 = arith.select %131, %143, %144 : vector<8x1xi1>, vector<8x1xf32>
    %cst_38 = arith.constant 1.57079637 : f32
    %146 = vector.broadcast %cst_38 : f32 to vector<8x1xf32>
    %147 = arith.select %127, %146, %145 : vector<8x1xi1>, vector<8x1xf32>
    %148 = arith.mulf %142, %142 : vector<8x1xf32>
    %cst_39 = arith.constant 0.0805374458 : f32
    %149 = vector.broadcast %cst_39 : f32 to vector<8x1xf32>
    %150 = arith.mulf %149, %148 : vector<8x1xf32>
    %cst_40 = arith.constant 0.138776854 : f32
    %151 = vector.broadcast %cst_40 : f32 to vector<8x1xf32>
    %152 = arith.subf %150, %151 : vector<8x1xf32>
    %153 = arith.mulf %152, %148 : vector<8x1xf32>
    %cst_41 = arith.constant 0.199777111 : f32
    %154 = vector.broadcast %cst_41 : f32 to vector<8x1xf32>
    %155 = arith.addf %153, %154 : vector<8x1xf32>
    %156 = arith.mulf %155, %148 : vector<8x1xf32>
    %cst_42 = arith.constant 0.333329499 : f32
    %157 = vector.broadcast %cst_42 : f32 to vector<8x1xf32>
    %158 = arith.subf %156, %157 : vector<8x1xf32>
    %159 = arith.mulf %158, %148 : vector<8x1xf32>
    %160 = arith.mulf %159, %142 : vector<8x1xf32>
    %161 = arith.addf %160, %142 : vector<8x1xf32>
    %162 = arith.addf %147, %161 : vector<8x1xf32>
    %cst_43 = arith.constant 0.000000e+00 : f32
    %163 = vector.broadcast %cst_43 : f32 to vector<8x1xf32>
    %164 = arith.cmpf olt, %124, %163 : vector<8x1xf32>
    %cst_44 = arith.constant 0.000000e+00 : f32
    %165 = vector.broadcast %cst_44 : f32 to vector<8x1xf32>
    %166 = arith.subf %165, %162 : vector<8x1xf32>
    %167 = arith.select %164, %166, %162 : vector<8x1xi1>, vector<8x1xf32>
    %168 = arith.subf %7, %3 : vector<1x256xf32>
    %169 = arith.subf %9, %5 : vector<1x256xf32>
    %cst_45 = arith.constant 1.000000e-07 : f32
    %170 = vector.broadcast %cst_45 : f32 to vector<1x256xf32>
    %171 = arith.addf %169, %170 : vector<1x256xf32>
    %172 = arith.divf %168, %171 : vector<1x256xf32>
    %173 = math.absf %172 : vector<1x256xf32>
    %cst_46 = arith.constant 2.41421366 : f32
    %174 = vector.broadcast %cst_46 : f32 to vector<1x256xf32>
    %175 = arith.cmpf ogt, %173, %174 : vector<1x256xf32>
    %cst_47 = arith.constant 0.414213568 : f32
    %176 = vector.broadcast %cst_47 : f32 to vector<1x256xf32>
    %177 = arith.cmpf ogt, %173, %176 : vector<1x256xf32>
    %cst_48 = arith.constant dense<true> : vector<1x256xi1>
    %178 = arith.xori %175, %cst_48 : vector<1x256xi1>
    %179 = arith.andi %177, %178 : vector<1x256xi1>
    %cst_49 = arith.constant 1.000000e+00 : f32
    %180 = vector.broadcast %cst_49 : f32 to vector<1x256xf32>
    %181 = arith.select %175, %173, %180 : vector<1x256xi1>, vector<1x256xf32>
    %cst_50 = arith.constant -1.000000e+00 : f32
    %182 = vector.broadcast %cst_50 : f32 to vector<1x256xf32>
    %183 = arith.divf %182, %181 : vector<1x256xf32>
    %cst_51 = arith.constant 1.000000e+00 : f32
    %184 = vector.broadcast %cst_51 : f32 to vector<1x256xf32>
    %185 = arith.subf %173, %184 : vector<1x256xf32>
    %cst_52 = arith.constant 1.000000e+00 : f32
    %186 = vector.broadcast %cst_52 : f32 to vector<1x256xf32>
    %187 = arith.addf %173, %186 : vector<1x256xf32>
    %188 = arith.divf %185, %187 : vector<1x256xf32>
    %189 = arith.select %179, %188, %173 : vector<1x256xi1>, vector<1x256xf32>
    %190 = arith.select %175, %183, %189 : vector<1x256xi1>, vector<1x256xf32>
    %cst_53 = arith.constant 0.785398185 : f32
    %cst_54 = arith.constant 0.000000e+00 : f32
    %191 = vector.broadcast %cst_53 : f32 to vector<1x256xf32>
    %192 = vector.broadcast %cst_54 : f32 to vector<1x256xf32>
    %193 = arith.select %179, %191, %192 : vector<1x256xi1>, vector<1x256xf32>
    %cst_55 = arith.constant 1.57079637 : f32
    %194 = vector.broadcast %cst_55 : f32 to vector<1x256xf32>
    %195 = arith.select %175, %194, %193 : vector<1x256xi1>, vector<1x256xf32>
    %196 = arith.mulf %190, %190 : vector<1x256xf32>
    %cst_56 = arith.constant 0.0805374458 : f32
    %197 = vector.broadcast %cst_56 : f32 to vector<1x256xf32>
    %198 = arith.mulf %197, %196 : vector<1x256xf32>
    %cst_57 = arith.constant 0.138776854 : f32
    %199 = vector.broadcast %cst_57 : f32 to vector<1x256xf32>
    %200 = arith.subf %198, %199 : vector<1x256xf32>
    %201 = arith.mulf %200, %196 : vector<1x256xf32>
    %cst_58 = arith.constant 0.199777111 : f32
    %202 = vector.broadcast %cst_58 : f32 to vector<1x256xf32>
    %203 = arith.addf %201, %202 : vector<1x256xf32>
    %204 = arith.mulf %203, %196 : vector<1x256xf32>
    %cst_59 = arith.constant 0.333329499 : f32
    %205 = vector.broadcast %cst_59 : f32 to vector<1x256xf32>
    %206 = arith.subf %204, %205 : vector<1x256xf32>
    %207 = arith.mulf %206, %196 : vector<1x256xf32>
    %208 = arith.mulf %207, %190 : vector<1x256xf32>
    %209 = arith.addf %208, %190 : vector<1x256xf32>
    %210 = arith.addf %195, %209 : vector<1x256xf32>
    %cst_60 = arith.constant 0.000000e+00 : f32
    %211 = vector.broadcast %cst_60 : f32 to vector<1x256xf32>
    %212 = arith.cmpf olt, %172, %211 : vector<1x256xf32>
    %cst_61 = arith.constant 0.000000e+00 : f32
    %213 = vector.broadcast %cst_61 : f32 to vector<1x256xf32>
    %214 = arith.subf %213, %210 : vector<1x256xf32>
    %215 = arith.select %212, %214, %210 : vector<1x256xi1>, vector<1x256xf32>
    %216 = vector.broadcast %167 : vector<8x1xf32> to vector<8x256xf32>
    %217 = vector.broadcast %215 : vector<1x256xf32> to vector<8x256xf32>
    %218 = arith.subf %216, %217 : vector<8x256xf32>
    %219 = arith.mulf %218, %218 : vector<8x256xf32>
    %cst_62 = arith.constant 0.405284733 : f32
    %220 = vector.broadcast %cst_62 : f32 to vector<8x256xf32>
    %221 = arith.mulf %220, %219 : vector<8x256xf32>
    %cst_63 = arith.constant 1.000000e+00 : f32
    %222 = vector.broadcast %cst_63 : f32 to vector<8x256xf32>
    %223 = arith.subf %222, %73 : vector<8x256xf32>
    %224 = arith.addf %223, %221 : vector<8x256xf32>
    %cst_64 = arith.constant 1.000000e-07 : f32
    %225 = vector.broadcast %cst_64 : f32 to vector<8x256xf32>
    %226 = arith.addf %224, %225 : vector<8x256xf32>
    %227 = arith.divf %221, %226 : vector<8x256xf32>
    %228 = arith.mulf %227, %221 : vector<8x256xf32>
    %229 = arith.subf %119, %228 : vector<8x256xf32>
    %cst_65 = arith.constant 0.000000e+00 : f32
    %230 = vector.broadcast %cst_65 : f32 to vector<8x256xf32>
    %231 = arith.maximumf %229, %230 : vector<8x256xf32>
    %232 = arith.mulf %231, %41 : vector<8x256xf32>
    %233 = tpu.iota {dimensions = array<i32: 1>} : vector<8x16xi32>
    %234 = vector.broadcast %19 : vector<8x1xi32> to vector<8x16xi32>
    %235 = arith.cmpi eq, %234, %233 : vector<8x16xi32>
    %236 = arith.extui %235 : vector<8x16xi1> to vector<8x16xi32>
    %237 = arith.sitofp %236 : vector<8x16xi32> to vector<8x16xf32>
    %cst_66 = arith.constant dense<0.000000e+00> : vector<8x256xf32>
    %238 = tpu.matmul %237, %1, %cst_66 {dimension_numbers = #tpu.dot_dimension_numbers<[1], [0], [0], [1], [0, 0, 1, 1], [], []>, precision = #tpu.contract_precision<fp32>} : vector<8x16xf32>, vector<16x256xf32>, vector<8x256xf32> -> vector<8x256xf32>
    %239 = arith.mulf %232, %232 : vector<8x256xf32>
    %240 = arith.mulf %239, %239 : vector<8x256xf32>
    %241 = arith.mulf %239, %240 : vector<8x256xf32>
    %242 = arith.mulf %238, %241 : vector<8x256xf32>
    %243 = tpu.iota {dimensions = array<i32: 1>} : vector<8x256xi32>
    %244 = arith.sitofp %243 : vector<8x256xi32> to vector<8x256xf32>
    %cst_67 = arith.constant 0.000000e+00 : f32
    %245 = vector.broadcast %cst_67 : f32 to vector<8x256xf32>
    %246 = arith.cmpf ogt, %242, %245 : vector<8x256xf32>
    %cst_68 = arith.constant -1.000000e-30 : f32
    %247 = vector.broadcast %cst_68 : f32 to vector<8x256xf32>
    %248 = arith.mulf %244, %247 : vector<8x256xf32>
    %249 = arith.select %246, %242, %248 : vector<8x256xi1>, vector<8x256xf32>
    %cst_69 = arith.constant 0.000000e+00 : f32
    %250 = vector.broadcast %cst_69 : f32 to vector<8x256xf32>
    %c0_i32 = arith.constant 0 : i32
    %cst_70 = arith.constant dense<0xFF800000> : vector<8xf32>
    %251 = vector.multi_reduction <maximumf>, %249, %cst_70 [1] : vector<8x256xf32> to vector<8xf32>
    %252 = vector.shape_cast %251 : vector<8xf32> to vector<8x1xf32>
    %253 = vector.broadcast %252 : vector<8x1xf32> to vector<8x256xf32>
    %254 = arith.cmpf oeq, %249, %253 : vector<8x256xf32>
    %cst_71 = arith.constant 0xFF800000 : f32
    %255 = vector.broadcast %cst_71 : f32 to vector<8x256xf32>
    %256 = arith.select %254, %255, %249 : vector<8x256xi1>, vector<8x256xf32>
    %257 = arith.extui %254 : vector<8x256xi1> to vector<8x256xi32>
    %258 = arith.sitofp %257 : vector<8x256xi32> to vector<8x256xf32>
    %259 = arith.addf %250, %258 : vector<8x256xf32>
    %c1_i32 = arith.constant 1 : i32
    %cst_72 = arith.constant dense<0xFF800000> : vector<8xf32>
    %260 = vector.multi_reduction <maximumf>, %256, %cst_72 [1] : vector<8x256xf32> to vector<8xf32>
    %261 = vector.shape_cast %260 : vector<8xf32> to vector<8x1xf32>
    %262 = vector.broadcast %261 : vector<8x1xf32> to vector<8x256xf32>
    %263 = arith.cmpf oeq, %256, %262 : vector<8x256xf32>
    %cst_73 = arith.constant 0xFF800000 : f32
    %264 = vector.broadcast %cst_73 : f32 to vector<8x256xf32>
    %265 = arith.select %263, %264, %256 : vector<8x256xi1>, vector<8x256xf32>
    %266 = arith.extui %263 : vector<8x256xi1> to vector<8x256xi32>
    %267 = arith.sitofp %266 : vector<8x256xi32> to vector<8x256xf32>
    %268 = arith.addf %259, %267 : vector<8x256xf32>
    %c2_i32 = arith.constant 2 : i32
    %cst_74 = arith.constant dense<0xFF800000> : vector<8xf32>
    %269 = vector.multi_reduction <maximumf>, %265, %cst_74 [1] : vector<8x256xf32> to vector<8xf32>
    %270 = vector.shape_cast %269 : vector<8xf32> to vector<8x1xf32>
    %271 = vector.broadcast %270 : vector<8x1xf32> to vector<8x256xf32>
    %272 = arith.cmpf oeq, %265, %271 : vector<8x256xf32>
    %cst_75 = arith.constant 0xFF800000 : f32
    %273 = vector.broadcast %cst_75 : f32 to vector<8x256xf32>
    %274 = arith.select %272, %273, %265 : vector<8x256xi1>, vector<8x256xf32>
    %275 = arith.extui %272 : vector<8x256xi1> to vector<8x256xi32>
    %276 = arith.sitofp %275 : vector<8x256xi32> to vector<8x256xf32>
    %277 = arith.addf %268, %276 : vector<8x256xf32>
    %c3_i32 = arith.constant 3 : i32
    %cst_76 = arith.constant dense<0xFF800000> : vector<8xf32>
    %278 = vector.multi_reduction <maximumf>, %274, %cst_76 [1] : vector<8x256xf32> to vector<8xf32>
    %279 = vector.shape_cast %278 : vector<8xf32> to vector<8x1xf32>
    %280 = vector.broadcast %279 : vector<8x1xf32> to vector<8x256xf32>
    %281 = arith.cmpf oeq, %274, %280 : vector<8x256xf32>
    %cst_77 = arith.constant 0xFF800000 : f32
    %282 = vector.broadcast %cst_77 : f32 to vector<8x256xf32>
    %283 = arith.select %281, %282, %274 : vector<8x256xi1>, vector<8x256xf32>
    %284 = arith.extui %281 : vector<8x256xi1> to vector<8x256xi32>
    %285 = arith.sitofp %284 : vector<8x256xi32> to vector<8x256xf32>
    %286 = arith.addf %277, %285 : vector<8x256xf32>
    %c4_i32 = arith.constant 4 : i32
    %cst_78 = arith.constant dense<0xFF800000> : vector<8xf32>
    %287 = vector.multi_reduction <maximumf>, %283, %cst_78 [1] : vector<8x256xf32> to vector<8xf32>
    %288 = vector.shape_cast %287 : vector<8xf32> to vector<8x1xf32>
    %289 = vector.broadcast %288 : vector<8x1xf32> to vector<8x256xf32>
    %290 = arith.cmpf oeq, %283, %289 : vector<8x256xf32>
    %cst_79 = arith.constant 0xFF800000 : f32
    %291 = vector.broadcast %cst_79 : f32 to vector<8x256xf32>
    %292 = arith.select %290, %291, %283 : vector<8x256xi1>, vector<8x256xf32>
    %293 = arith.extui %290 : vector<8x256xi1> to vector<8x256xi32>
    %294 = arith.sitofp %293 : vector<8x256xi32> to vector<8x256xf32>
    %295 = arith.addf %286, %294 : vector<8x256xf32>
    %c5_i32 = arith.constant 5 : i32
    %cst_80 = arith.constant dense<0xFF800000> : vector<8xf32>
    %296 = vector.multi_reduction <maximumf>, %292, %cst_80 [1] : vector<8x256xf32> to vector<8xf32>
    %297 = vector.shape_cast %296 : vector<8xf32> to vector<8x1xf32>
    %298 = vector.broadcast %297 : vector<8x1xf32> to vector<8x256xf32>
    %299 = arith.cmpf oeq, %292, %298 : vector<8x256xf32>
    %cst_81 = arith.constant 0xFF800000 : f32
    %300 = vector.broadcast %cst_81 : f32 to vector<8x256xf32>
    %301 = arith.select %299, %300, %292 : vector<8x256xi1>, vector<8x256xf32>
    %302 = arith.extui %299 : vector<8x256xi1> to vector<8x256xi32>
    %303 = arith.sitofp %302 : vector<8x256xi32> to vector<8x256xf32>
    %304 = arith.addf %295, %303 : vector<8x256xf32>
    %c6_i32 = arith.constant 6 : i32
    %cst_82 = arith.constant dense<0xFF800000> : vector<8xf32>
    %305 = vector.multi_reduction <maximumf>, %301, %cst_82 [1] : vector<8x256xf32> to vector<8xf32>
    %306 = vector.shape_cast %305 : vector<8xf32> to vector<8x1xf32>
    %307 = vector.broadcast %306 : vector<8x1xf32> to vector<8x256xf32>
    %308 = arith.cmpf oeq, %301, %307 : vector<8x256xf32>
    %cst_83 = arith.constant 0xFF800000 : f32
    %309 = vector.broadcast %cst_83 : f32 to vector<8x256xf32>
    %310 = arith.select %308, %309, %301 : vector<8x256xi1>, vector<8x256xf32>
    %311 = arith.extui %308 : vector<8x256xi1> to vector<8x256xi32>
    %312 = arith.sitofp %311 : vector<8x256xi32> to vector<8x256xf32>
    %313 = arith.addf %304, %312 : vector<8x256xf32>
    %c7_i32 = arith.constant 7 : i32
    %cst_84 = arith.constant dense<0xFF800000> : vector<8xf32>
    %314 = vector.multi_reduction <maximumf>, %310, %cst_84 [1] : vector<8x256xf32> to vector<8xf32>
    %315 = vector.shape_cast %314 : vector<8xf32> to vector<8x1xf32>
    %316 = vector.broadcast %315 : vector<8x1xf32> to vector<8x256xf32>
    %317 = arith.cmpf oeq, %310, %316 : vector<8x256xf32>
    %cst_85 = arith.constant 0xFF800000 : f32
    %318 = vector.broadcast %cst_85 : f32 to vector<8x256xf32>
    %319 = arith.select %317, %318, %310 : vector<8x256xi1>, vector<8x256xf32>
    %320 = arith.extui %317 : vector<8x256xi1> to vector<8x256xi32>
    %321 = arith.sitofp %320 : vector<8x256xi32> to vector<8x256xf32>
    %322 = arith.addf %313, %321 : vector<8x256xf32>
    %c8_i32 = arith.constant 8 : i32
    %cst_86 = arith.constant dense<0xFF800000> : vector<8xf32>
    %323 = vector.multi_reduction <maximumf>, %319, %cst_86 [1] : vector<8x256xf32> to vector<8xf32>
    %324 = vector.shape_cast %323 : vector<8xf32> to vector<8x1xf32>
    %325 = vector.broadcast %324 : vector<8x1xf32> to vector<8x256xf32>
    %326 = arith.cmpf oeq, %319, %325 : vector<8x256xf32>
    %cst_87 = arith.constant 0xFF800000 : f32
    %327 = vector.broadcast %cst_87 : f32 to vector<8x256xf32>
    %328 = arith.select %326, %327, %319 : vector<8x256xi1>, vector<8x256xf32>
    %329 = arith.extui %326 : vector<8x256xi1> to vector<8x256xi32>
    %330 = arith.sitofp %329 : vector<8x256xi32> to vector<8x256xf32>
    %331 = arith.addf %322, %330 : vector<8x256xf32>
    %c9_i32 = arith.constant 9 : i32
    %cst_88 = arith.constant dense<0xFF800000> : vector<8xf32>
    %332 = vector.multi_reduction <maximumf>, %328, %cst_88 [1] : vector<8x256xf32> to vector<8xf32>
    %333 = vector.shape_cast %332 : vector<8xf32> to vector<8x1xf32>
    %334 = vector.broadcast %333 : vector<8x1xf32> to vector<8x256xf32>
    %335 = arith.cmpf oeq, %328, %334 : vector<8x256xf32>
    %cst_89 = arith.constant 0xFF800000 : f32
    %336 = vector.broadcast %cst_89 : f32 to vector<8x256xf32>
    %337 = arith.select %335, %336, %328 : vector<8x256xi1>, vector<8x256xf32>
    %338 = arith.extui %335 : vector<8x256xi1> to vector<8x256xi32>
    %339 = arith.sitofp %338 : vector<8x256xi32> to vector<8x256xf32>
    %340 = arith.addf %331, %339 : vector<8x256xf32>
    %c10_i32 = arith.constant 10 : i32
    %cst_90 = arith.constant dense<0xFF800000> : vector<8xf32>
    %341 = vector.multi_reduction <maximumf>, %337, %cst_90 [1] : vector<8x256xf32> to vector<8xf32>
    %342 = vector.shape_cast %341 : vector<8xf32> to vector<8x1xf32>
    %343 = vector.broadcast %342 : vector<8x1xf32> to vector<8x256xf32>
    %344 = arith.cmpf oeq, %337, %343 : vector<8x256xf32>
    %cst_91 = arith.constant 0xFF800000 : f32
    %345 = vector.broadcast %cst_91 : f32 to vector<8x256xf32>
    %346 = arith.select %344, %345, %337 : vector<8x256xi1>, vector<8x256xf32>
    %347 = arith.extui %344 : vector<8x256xi1> to vector<8x256xi32>
    %348 = arith.sitofp %347 : vector<8x256xi32> to vector<8x256xf32>
    %349 = arith.addf %340, %348 : vector<8x256xf32>
    %c11_i32 = arith.constant 11 : i32
    %cst_92 = arith.constant dense<0xFF800000> : vector<8xf32>
    %350 = vector.multi_reduction <maximumf>, %346, %cst_92 [1] : vector<8x256xf32> to vector<8xf32>
    %351 = vector.shape_cast %350 : vector<8xf32> to vector<8x1xf32>
    %352 = vector.broadcast %351 : vector<8x1xf32> to vector<8x256xf32>
    %353 = arith.cmpf oeq, %346, %352 : vector<8x256xf32>
    %cst_93 = arith.constant 0xFF800000 : f32
    %354 = vector.broadcast %cst_93 : f32 to vector<8x256xf32>
    %355 = arith.select %353, %354, %346 : vector<8x256xi1>, vector<8x256xf32>
    %356 = arith.extui %353 : vector<8x256xi1> to vector<8x256xi32>
    %357 = arith.sitofp %356 : vector<8x256xi32> to vector<8x256xf32>
    %358 = arith.addf %349, %357 : vector<8x256xf32>
    %c12_i32 = arith.constant 12 : i32
    %cst_94 = arith.constant dense<0xFF800000> : vector<8xf32>
    %359 = vector.multi_reduction <maximumf>, %355, %cst_94 [1] : vector<8x256xf32> to vector<8xf32>
    %360 = vector.shape_cast %359 : vector<8xf32> to vector<8x1xf32>
    %361 = vector.broadcast %360 : vector<8x1xf32> to vector<8x256xf32>
    %362 = arith.cmpf oeq, %355, %361 : vector<8x256xf32>
    %cst_95 = arith.constant 0xFF800000 : f32
    %363 = vector.broadcast %cst_95 : f32 to vector<8x256xf32>
    %364 = arith.select %362, %363, %355 : vector<8x256xi1>, vector<8x256xf32>
    %365 = arith.extui %362 : vector<8x256xi1> to vector<8x256xi32>
    %366 = arith.sitofp %365 : vector<8x256xi32> to vector<8x256xf32>
    %367 = arith.addf %358, %366 : vector<8x256xf32>
    %368 = arith.mulf %367, %41 : vector<8x256xf32>
    %cst_96 = arith.constant dense<0.000000e+00> : vector<256xf32>
    %369 = vector.multi_reduction <add>, %368, %cst_96 [0] : vector<8x256xf32> to vector<256xf32>
    %370 = vector.shape_cast %369 : vector<256xf32> to vector<1x256xf32>
    %cst_97 = arith.constant 0.000000e+00 : f32
    %371 = vector.broadcast %cst_97 : f32 to vector<1x256xf32>
    %372 = arith.cmpf ogt, %370, %371 : vector<1x256xf32>
    %cst_98 = arith.constant dense<0xFF800000> : vector<256xf32>
    %373 = vector.multi_reduction <maximumf>, %232, %cst_98 [0] : vector<8x256xf32> to vector<256xf32>
    %374 = vector.shape_cast %373 : vector<256xf32> to vector<1x256xf32>
    %375 = vector.broadcast %374 : vector<1x256xf32> to vector<8x256xf32>
    %376 = arith.cmpf oeq, %232, %375 : vector<8x256xf32>
    %377 = arith.extui %376 : vector<8x256xi1> to vector<8x256xi32>
    %378 = arith.sitofp %377 : vector<8x256xi32> to vector<8x256xf32>
    %cst_99 = arith.constant 1.000000e+00 : f32
    %379 = vector.broadcast %cst_99 : f32 to vector<1x256xf32>
    %380 = arith.cmpf ogt, %370, %379 : vector<1x256xf32>
    %381 = vector.shape_cast %380 : vector<1x256xi1> to vector<1x256xi1>
    %382 = vector.broadcast %381 : vector<1x256xi1> to vector<8x256xi1>
    %383 = arith.select %382, %378, %368 : vector<8x256xi1>, vector<8x256xf32>
    %384 = tpu.iota {dimensions = array<i32: 0>} : vector<8x256xi32>
    %cst_100 = arith.constant 5.000000e-01 : f32
    %385 = vector.broadcast %cst_100 : f32 to vector<8x256xf32>
    %386 = arith.cmpf ogt, %383, %385 : vector<8x256xf32>
    %c8_i32_101 = arith.constant 8 : i32
    %387 = vector.broadcast %c8_i32_101 : i32 to vector<8x256xi32>
    %388 = arith.select %386, %384, %387 : vector<8x256xi1>, vector<8x256xi32>
    %cst_102 = arith.constant dense<2147483647> : vector<256xi32>
    %389 = vector.multi_reduction <minsi>, %388, %cst_102 [0] : vector<8x256xi32> to vector<256xi32>
    %390 = vector.shape_cast %389 : vector<256xi32> to vector<1x256xi32>
    %c8_i32_103 = arith.constant 8 : i32
    %391 = vector.broadcast %c8_i32_103 : i32 to vector<1x256xi32>
    %392 = arith.cmpi eq, %390, %391 : vector<1x256xi32>
    %c0_i32_104 = arith.constant 0 : i32
    %393 = vector.broadcast %c0_i32_104 : i32 to vector<1x256xi32>
    %394 = arith.select %392, %393, %390 : vector<1x256xi1>, vector<1x256xi32>
    %395 = vector.broadcast %394 : vector<1x256xi32> to vector<8x256xi32>
    %396 = arith.cmpi eq, %384, %395 : vector<8x256xi32>
    %397 = arith.extui %396 : vector<8x256xi1> to vector<8x256xi32>
    %398 = arith.sitofp %397 : vector<8x256xi32> to vector<8x256xf32>
    %399 = vector.broadcast %14 : vector<8x1xf32> to vector<8x256xf32>
    %400 = arith.mulf %398, %399 : vector<8x256xf32>
    %cst_105 = arith.constant dense<0.000000e+00> : vector<256xf32>
    %401 = vector.multi_reduction <add>, %400, %cst_105 [0] : vector<8x256xf32> to vector<256xf32>
    %402 = vector.shape_cast %401 : vector<256xf32> to vector<1x256xf32>
    %403 = vector.broadcast %15 : vector<8x1xf32> to vector<8x256xf32>
    %404 = arith.mulf %398, %403 : vector<8x256xf32>
    %cst_106 = arith.constant dense<0.000000e+00> : vector<256xf32>
    %405 = vector.multi_reduction <add>, %404, %cst_106 [0] : vector<8x256xf32> to vector<256xf32>
    %406 = vector.shape_cast %405 : vector<256xf32> to vector<1x256xf32>
    %407 = vector.broadcast %16 : vector<8x1xf32> to vector<8x256xf32>
    %408 = arith.mulf %398, %407 : vector<8x256xf32>
    %cst_107 = arith.constant dense<0.000000e+00> : vector<256xf32>
    %409 = vector.multi_reduction <add>, %408, %cst_107 [0] : vector<8x256xf32> to vector<256xf32>
    %410 = vector.shape_cast %409 : vector<256xf32> to vector<1x256xf32>
    %411 = vector.broadcast %17 : vector<8x1xf32> to vector<8x256xf32>
    %412 = arith.mulf %398, %411 : vector<8x256xf32>
    %cst_108 = arith.constant dense<0.000000e+00> : vector<256xf32>
    %413 = vector.multi_reduction <add>, %412, %cst_108 [0] : vector<8x256xf32> to vector<256xf32>
    %414 = vector.shape_cast %413 : vector<256xf32> to vector<1x256xf32>
    %415 = tpu.concatenate %402, %406, %410, %414 in 0 : vector<1x256xf32>, vector<1x256xf32>, vector<1x256xf32>, vector<1x256xf32> -> vector<4x256xf32>
    %c0_109 = arith.constant 0 : index
    %c0_110 = arith.constant 0 : index
    %c0_111 = arith.constant 0 : index
    %416 = vector.load %arg6[%c0_109, %c0_110, %c0_111] : memref<1x4x256xf32, #tpu.memory_space<vmem>>, vector<1x4x256xf32>
    %417 = vector.shape_cast %416 : vector<1x4x256xf32> to vector<4x256xf32>
    %418 = vector.shape_cast %415 : vector<4x256xf32> to vector<1x4x256xf32>
    tpu.vector_store %arg6[%c0_109, %c0_110, %c0_111], %418 {strides = array<i32>} : memref<1x4x256xf32, #tpu.memory_space<vmem>>, vector<1x4x256xf32>,
    %419 = vector.broadcast %18 : vector<8x1xf32> to vector<8x256xf32>
    %420 = arith.mulf %398, %419 : vector<8x256xf32>
    %cst_112 = arith.constant dense<0.000000e+00> : vector<256xf32>
    %421 = vector.multi_reduction <add>, %420, %cst_112 [0] : vector<8x256xf32> to vector<256xf32>
    %422 = vector.shape_cast %421 : vector<256xf32> to vector<1x256xf32>
    %cst_113 = arith.constant 1.600000e+01 : f32
    %423 = vector.broadcast %cst_113 : f32 to vector<1x256xf32>
    %424 = arith.select %372, %422, %423 : vector<1x256xi1>, vector<1x256xf32>
    %425 = arith.fptosi %424 : vector<1x256xf32> to vector<1x256xi32>
    %c0_114 = arith.constant 0 : index
    %c0_115 = arith.constant 0 : index
    %c0_116 = arith.constant 0 : index
    %426 = vector.load %arg5[%c0_114, %c0_115, %c0_116] : memref<1x1x256xi32, #tpu.memory_space<vmem>>, vector<1x1x256xi32>
    %427 = vector.shape_cast %426 : vector<1x1x256xi32> to vector<1x256xi32>
    %428 = vector.shape_cast %425 : vector<1x256xi32> to vector<1x1x256xi32>
    tpu.vector_store %arg5[%c0_114, %c0_115, %c0_116], %428 {strides = array<i32>} : memref<1x1x256xi32, #tpu.memory_space<vmem>>, vector<1x1x256xi32>,
    %429 = arith.mulf %242, %383 : vector<8x256xf32>
    %cst_117 = arith.constant dense<0xFF800000> : vector<8xf32>
    %430 = vector.multi_reduction <maximumf>, %429, %cst_117 [1] : vector<8x256xf32> to vector<8xf32>
    %431 = vector.shape_cast %430 : vector<8xf32> to vector<8x1xf32>
    %432 = arith.mulf %232, %383 : vector<8x256xf32>
    %cst_118 = arith.constant dense<0xFF800000> : vector<8xf32>
    %433 = vector.multi_reduction <maximumf>, %432, %cst_118 [1] : vector<8x256xf32> to vector<8xf32>
    %434 = vector.shape_cast %433 : vector<8xf32> to vector<8x1xf32>
    %cst_119 = arith.constant 9.99999971E-10 : f32
    %435 = vector.broadcast %cst_119 : f32 to vector<8x1xf32>
    %436 = arith.addf %431, %435 : vector<8x1xf32>
    %437 = tpu.reciprocal %436 {approx = true} : vector<8x1xf32> -> vector<8x1xf32>
    %438 = arith.mulf %434, %437 : vector<8x1xf32>
    %439 = vector.broadcast %438 : vector<8x1xf32> to vector<8x256xf32>
    %440 = arith.mulf %429, %439 : vector<8x256xf32>
    %cst_120 = arith.constant dense<0xFF800000> : vector<256xf32>
    %441 = vector.multi_reduction <maximumf>, %440, %cst_120 [0] : vector<8x256xf32> to vector<256xf32>
    %442 = vector.shape_cast %441 : vector<256xf32> to vector<1x256xf32>
    %443 = tpu.transpose %237, [1, 0] : vector<8x16xf32> -> vector<16x8xf32>
    %444 = vector.broadcast %442 : vector<1x256xf32> to vector<8x256xf32>
    %445 = arith.mulf %398, %444 : vector<8x256xf32>
    %cst_121 = arith.constant dense<0.000000e+00> : vector<16x256xf32>
    %446 = tpu.matmul %443, %445, %cst_121 {dimension_numbers = #tpu.dot_dimension_numbers<[1], [0], [0], [1], [0, 0, 1, 1], [], []>, precision = #tpu.contract_precision<fp32>} : vector<16x8xf32>, vector<8x256xf32>, vector<16x256xf32> -> vector<16x256xf32>
    %c0_122 = arith.constant 0 : index
    %c0_123 = arith.constant 0 : index
    %c0_124 = arith.constant 0 : index
    %447 = vector.load %arg7[%c0_122, %c0_123, %c0_124] : memref<1x16x256xf32, #tpu.memory_space<vmem>>, vector<1x16x256xf32>
    %448 = vector.shape_cast %447 : vector<1x16x256xf32> to vector<16x256xf32>
    %449 = vector.shape_cast %446 : vector<16x256xf32> to vector<1x16x256xf32>
    tpu.vector_store %arg7[%c0_122, %c0_123, %c0_124], %449 {strides = array<i32>} : memref<1x16x256xf32, #tpu.memory_space<vmem>>, vector<1x16x256xf32>,
    %450 = arith.extui %372 : vector<1x256xi1> to vector<1x256xi32>
    %c0_125 = arith.constant 0 : index
    %c0_126 = arith.constant 0 : index
    %c0_127 = arith.constant 0 : index
    %451 = vector.load %arg8[%c0_125, %c0_126, %c0_127] : memref<1x1x256xi32, #tpu.memory_space<vmem>>, vector<1x1x256xi32>
    %452 = vector.shape_cast %451 : vector<1x1x256xi32> to vector<1x256xi32>
    %453 = vector.shape_cast %450 : vector<1x256xi32> to vector<1x1x256xi32>
    tpu.vector_store %arg8[%c0_125, %c0_126, %c0_127], %453 {strides = array<i32>} : memref<1x1x256xi32, #tpu.memory_space<vmem>>, vector<1x1x256xi32>,
    return
  }
  func.func @transform_0(%arg0: i32) -> (i32, i32, i32) {
    %c0_i32 = arith.constant 0 : i32
    %c0_i32_0 = arith.constant 0 : i32
    %c0_i32_1 = arith.constant 0 : i32
    return %arg0, %c0_i32, %c0_i32_0 : i32, i32, i32
  }
  func.func @transform_1(%arg0: i32) -> (i32, i32, i32) {
    %c0_i32 = arith.constant 0 : i32
    %c0_i32_0 = arith.constant 0 : i32
    %c0_i32_1 = arith.constant 0 : i32
    return %arg0, %c0_i32, %c0_i32_0 : i32, i32, i32
  }
  func.func @transform_2(%arg0: i32) -> (i32, i32) {
    %c0_i32 = arith.constant 0 : i32
    %c0_i32_0 = arith.constant 0 : i32
    %c0_i32_1 = arith.constant 0 : i32
    return %c0_i32, %c0_i32_0 : i32, i32
  }
  func.func @transform_3(%arg0: i32) -> (i32, i32, i32) {
    %c0_i32 = arith.constant 0 : i32
    %c0_i32_0 = arith.constant 0 : i32
    %c0_i32_1 = arith.constant 0 : i32
    return %arg0, %c0_i32, %c0_i32_0 : i32, i32, i32
  }
  func.func @transform_4(%arg0: i32) -> (i32, i32, i32) {
    %c0_i32 = arith.constant 0 : i32
    %c0_i32_0 = arith.constant 0 : i32
    %c0_i32_1 = arith.constant 0 : i32
    return %arg0, %c0_i32, %c0_i32_0 : i32, i32, i32
  }
  func.func @transform_5(%arg0: i32) -> (i32, i32, i32) {
    %c0_i32 = arith.constant 0 : i32
    %c0_i32_0 = arith.constant 0 : i32
    %c0_i32_1 = arith.constant 0 : i32
    return %arg0, %c0_i32, %c0_i32_0 : i32, i32, i32
  }
  func.func @transform_6(%arg0: i32) -> (i32, i32, i32) {
    %c0_i32 = arith.constant 0 : i32
    %c0_i32_0 = arith.constant 0 : i32
    %c0_i32_1 = arith.constant 0 : i32
    return %arg0, %c0_i32, %c0_i32_0 : i32, i32, i32
  }
  func.func @transform_7(%arg0: i32) -> (i32, i32, i32) {
    %c0_i32 = arith.constant 0 : i32
    %c0_i32_0 = arith.constant 0 : i32
    %c0_i32_1 = arith.constant 0 : i32
    return %arg0, %c0_i32, %c0_i32_0 : i32, i32, i32
  }
}

</mosaic_0001>

<bundles_post_ra>
// kernel: tpu_custom_call.1
= control target key start
LH: loop header
LB: loop body
LE: loop exit
PB: predicated region body
PF: predicated region fallthrough
CT: control target
= control target key end

     0   :  { %s3810_s0 = inlined_call_operand.hbm [shape: f32[2,16,256], index: 0, kind: input, shape index: {}]   ;;  %s3811_s1 = inlined_call_operand.hbm [shape: f32[2,4,256], index: 1, kind: input, shape index: {}]   ;;  %s3812_s2 = inlined_call_operand.vmem [shape: f32[2,256], index: 2, kind: input, shape index: {}]   ;;  %s3813_s3 = inlined_call_operand.hbm [shape: f32[2,8,8], index: 3, kind: input, shape index: {}]   ;;  %s3814_s4 = inlined_call_operand.hbm [shape: s32[2,1,256], index: 4, kind: output, shape index: {0}]   ;;  %s3815_s5 = inlined_call_operand.hbm [shape: f32[2,4,256], index: 5, kind: output, shape index: {1}]   ;;  %s3816_s6 = inlined_call_operand.hbm [shape: f32[2,16,256], index: 6, kind: output, shape index: {2}]   ;;  %s3817_s7 = inlined_call_operand.hbm [shape: s32[2,1,256], index: 7, kind: output, shape index: {3}]  }
   0x1   :  { %3830 = sst [smem:[#allocation24_spill]] %s3811_s1 }
   0x2   :  { %13 = vsyncpa [#allocation3], 0 }
   0x3   :  { %15 = vsyncpa [#allocation3 + $0x1], 0 }
   0x4   :  { %16 = vsyncpa [#allocation6], 0 }
   0x5   :  { %18 = vsyncpa [#allocation6 + $0x1], 0 }
   0x6   :  { %19 = vsyncpa [#allocation4], 0 }
   0x7   :  { %21 = vsyncpa [#allocation4 + $0x1], 0 }
   0x8   :  { %22 = vsyncpa [#allocation10], 0 }
   0x9   :  { %24 = vsyncpa [#allocation10 + $0x1], 0 }
   0xa   :  { %25 = vsyncpa [#allocation13], 0 }
   0xb   :  { %27 = vsyncpa [#allocation13 + $0x1], 0  ;;  %s3116_s24 = smov 0   ;;  %s3118_s25 = smov 0  }
   0xc   :  { %s3120_s26 = smov 0   ;;  %s3122_s27 = smov 0  }
   0xd LB: > { %3831 = sst [smem:[#allocation19_spill]] %s3047_s26  ;;  %s3137_s28 = sadd.s32 4294967295, %s3051_s27   ;;  %s3051_s27 = sphi %s3122_s27, %s3858_s27   ;;  %s3047_s26 = sphi %s3120_s26, %s3860_s26   ;;  %s3043_s25 = sphi %s3118_s25, %s3862_s25   ;;  %s3039_s24 = sphi %s3116_s24, %s3861_s24  }
   0xe   : > { %3832 = sst [smem:[#allocation20_spill]] %s3051_s27  ;;  %s3818_s29 = sadd.s32 4294967294, %s3051_s27  }
   0xf   : > { %s3141_s30 = sadd.s32 1, %s3051_s27   ;;  %s40_s8 = sadd.s32 1, %s3047_s26 }
  0x10   : > { %3833 = sst [smem:[#allocation21_spill]] %s3141_s30  ;;  %s37_s9 = ssub.s32 %s3051_s27, %s3141_s30 }
  0x11   : > { %p47_p0 = scmp.ne.s32.totalorder %s3047_s26, %s3043_s25  ;;  %p38_p1 = scmp.eq.s32.totalorder %s37_s9, 0 }
  0x12   : > { %p48_p2 = scmp.eq.s32.totalorder %s3051_s27, 0  ;;  %p53_p3 = scmp.ne.s32.totalorder %s3043_s25, %s3039_s24 }
  0x13   : > { %p54_p4 = scmp.eq.s32.totalorder %s3137_s28, 0  ;;  %p150_p7 = scmp.eq.s32.totalorder %s3137_s28, 1 }
  0x14   : > { %s3153_s10 = scalar_select %p38_p1, %s3047_s26, %s40_s8  }
  0x15   : > { %p49_p5 = por %p48_p2, %p47_p0  ;;  %p3155_p6 = por %p54_p4, %p53_p3 }
  0x16   : > { %3834 = sst [smem:[#allocation22_spill]] %s3153_s10  ;;  %p156_p8 = scmp.eq.s32.totalorder %s3818_s29, 1 }
  0x17   : > { %s3835_s11 = scalar_select %p3155_p6, 1, 0 }
  0x18   : > { %p2711_p10 = scmp.lt.s32.totalorder %s3051_s27, 2  ;;  %p3164_p11 = por %p150_p7, %p47_p0 }
  0x19   : > { %p3168_p12 = por %p156_p8, %p53_p3  ;;  %s3173_s14 = sand.u32 1, %s3047_s26  }
  0x1a   : > { %s3836_s12 = scalar_select %p3164_p11, 1, 0 }
  0x1b   : > { %s3837_s13 = scalar_select %p3168_p12, 1, 0 }
  0x1c   : > { %p3175_p13 = pnand %p2711_p10, %p49_p5  ;;  %s278_s16 = sand.u32 1, %s3051_s27  }
  0x1d   : > { %3838 = sst [smem:[#allocation23_spill]] %s3837_s13  ;;  %s3819_s17 = sshll.u32 %s3173_s14, 3 }
  0x1e   : > { %s3839_s15 = scalar_select %p3175_p13, 1, 0 }
  0x1f   : > { %s3820_s18 = sshll.u32 %s3051_s27, 7  ;;  %s3840_s1 = sld [smem:[#allocation24_spill]] }
  0x20   : > { %s282_s22 = scalar_lea.vmem [#allocation5], %s3819_s17  ;;  %s3193_s8 = scalar_lea.sflag [#allocation6], %s278_s16 }
  0x21   : > { %s290_s23 = sshll.u32 %s282_s22, 4  ;;  %p3199_p1 = pneg %p3175_p13  ;;  %s3191_s23 = int_to_ptr.vmem [resolvable:$true] %s290_s23 }
  0x25   : > { %s3187_s21 = scalar_lea.hbm %s3840_s1, %s3820_s18  ;;  %s2804_s17 = scalar_lea.hbm %s3840_s1, 256 }
  0x26   : > { %s2799_s9 = scalar_lea.hbm %s3187_s21, 128  ;;  %p2805_p4 = scmp.lt.u32.totalorder %s3187_s21, %s3840_s1 }
  0x27   : > { %p2800_p0 = scmp.ne.s32.totalorder %s3187_s21, %s2799_s9  ;;  %p2806_p5 = scmp.lt.u32.totalorder %s2804_s17, %s2799_s9 }
  0x28   : > { %p2808_p8 = scmp.lt.u32.totalorder %s2799_s9, %s3187_s21 }
  0x29   : > { %p2802_p2 = pnand %p3199_p1, %p2800_p0  ;;  %p2807_p7 = por %p2806_p5, %p2805_p4 }
  0x2b   : > { %p2803_p3 = pneg %p2802_p2  ;;  %p2809_p10 = por %p2808_p8, %p2807_p7 }
  0x2d   : > { %p2810_p9 = pnand %p2809_p10, %p2803_p3 }
  0x2f   : > { %2813 = shalt.err (!%p2810_p9)
}
  0x30   : > { %s2814_s16 = scalar_lea.vmem %s3191_s23, 128  ;;  %s3053_s19 = smov [#allocation5]  }
  0x31   : > { %p2815_p0 = scmp.ne.s32.totalorder %s3191_s23, %s2814_s16  ;;  %s2819_s20 = sshll.u32 %s3053_s19, 4  ;;  %s2820_s20 = int_to_ptr.vmem [resolvable:$false] %s2819_s20 }
  0x32   : > { %s2821_s18 = scalar_lea.vmem %s2820_s20, 256  ;;  %p2822_p11 = scmp.lt.s32.totalorder %s3191_s23, %s2820_s20 }
  0x33   : > { %p2817_p2 = pnand %p2815_p0, %p3199_p1  ;;  %p2823_p6 = scmp.lt.s32.totalorder %s2821_s18, %s2814_s16 }
  0x35   : > { %p2818_p12 = pneg %p2817_p2  ;;  %p2824_p4 = por %p2823_p6, %p2822_p11 }
  0x37   : > { %p2825_p5 = pnand %p2824_p4, %p2818_p12 }
  0x39   : > { %2828 = shalt.err (!%p2825_p5)
}
  0x3a   : > { %2694 = dma.hbm_to_vmem [thread:$0]  (!%p3175_p13), %s3187_s21, 128, %s3191_s23, %s3193_s8  }
  0x3b   : > { %s3842_s17 = sshll.u32 %s3051_s27, 7  ;;  %p2538_p6 = scmp.ge.s32.totalorder %s3051_s27, 1 }
  0x3c   : > { %s3228_s16 = scalar_lea.hbm %s3813_s3, %s3842_s17  ;;  %p313_p9 = scmp.lt.s32.totalorder %s3051_s27, 3 }
  0x3d   : > { %s2530_s19 = sshll.u32 %s3173_s14, 5  ;;  %s2606_s20 = sshll.u32 %s3051_s27, 9 }
  0x3e   : > { %p3234_p11 = pnand %p2538_p6, %p313_p9  ;;  %s3241_s26 = scalar_lea.hbm %s3810_s0, %s2606_s20 }
  0x3f   : > { %s261_s21 = scalar_lea.vmem [#allocation2], %s2530_s19  ;;  %s3844_s17 = sshll.u32 %s3173_s14, 3 }
  0x40   : > { %s3843_s18 = scalar_select %p3234_p11, 1, 0 }
  0x41   : > { %s268_s23 = sshll.u32 %s261_s21, 4  ;;  %s3247_s9 = scalar_lea.vmem [#allocation7], %s3844_s17  ;;  %s3243_s23 = int_to_ptr.vmem [resolvable:$true] %s268_s23 }
  0x42   : > { %s308_s22 = sshll.u32 %s3247_s9, 4  ;;  %s258_s30 = scalar_lea.sflag [#allocation3], %s3173_s14  ;;  %s309_s22 = int_to_ptr.vmem [resolvable:$true] %s308_s22 }
  0x43   : > { %s2829_s27 = scalar_lea.hbm %s3241_s26, 512  ;;  %s2834_s20 = scalar_lea.hbm %s3810_s0, 1024 }
  0x44   : > { %p2830_p12 = scmp.ne.s32.totalorder %s3241_s26, %s2829_s27  ;;  %p2835_p8 = scmp.lt.u32.totalorder %s3241_s26, %s3810_s0 }
  0x45   : > { %p2836_p10 = scmp.lt.u32.totalorder %s2834_s20, %s2829_s27  ;;  %p2838_p2 = scmp.lt.u32.totalorder %s2829_s27, %s3241_s26 }
  0x46   : > { %p2832_p3 = pnand %p2830_p12, %p3199_p1 }
  0x47   : > { %p2837_p0 = por %p2836_p10, %p2835_p8 }
  0x48   : > { %p2833_p7 = pneg %p2832_p3 }
  0x49   : > { %p2839_p4 = por %p2838_p2, %p2837_p0 }
  0x4b   : > { %p2840_p5 = pnand %p2839_p4, %p2833_p7 }
  0x4d   : > { %2843 = shalt.err (!%p2840_p5)
}
  0x4e   : > { %s2844_s21 = scalar_lea.vmem %s3243_s23, 512  ;;  %s3054_s17 = smov [#allocation2]  }
  0x4f   : > { %p2845_p6 = scmp.ne.s32.totalorder %s3243_s23, %s2844_s21  ;;  %s2849_s1 = sshll.u32 %s3054_s17, 4  ;;  %s2850_s1 = int_to_ptr.vmem [resolvable:$false] %s2849_s1 }
  0x50   : > { %s2851_s13 = scalar_lea.vmem %s2850_s1, 1024  ;;  %p2852_p3 = scmp.lt.s32.totalorder %s3243_s23, %s2850_s1 }
  0x51   : > { %p2847_p9 = pnand %p2845_p6, %p3199_p1  ;;  %p2853_p11 = scmp.lt.s32.totalorder %s2851_s13, %s2844_s21 }
  0x53   : > { %p2848_p12 = pneg %p2847_p9  ;;  %p2854_p8 = por %p2853_p11, %p2852_p3 }
  0x55   : > { %p2855_p10 = pnand %p2854_p8, %p2848_p12 }
  0x57   : > { %2858 = shalt.err (!%p2855_p10)
}
  0x58   : > { %s3055_s27 = smov 256   ;;  %s3056_s10 = smov 16  }
  0x59   : > { %2691 = dma.hbm_to_vmem [thread:$0]  (!%p3175_p13), %s3241_s26, 512, %s3243_s23, %s258_s30, %s3055_s27, %s3055_s27, %s3056_s10  }
  0x5a   : > { %s2859_s20 = scalar_lea.hbm %s3228_s16, 128  ;;  %s2864_s17 = scalar_lea.hbm %s3813_s3, 256 }
  0x5b   : > { %p2860_p11 = scmp.ne.s32.totalorder %s3228_s16, %s2859_s20  ;;  %p2865_p2 = scmp.lt.u32.totalorder %s3228_s16, %s3813_s3 }
  0x5c   : > { %p2866_p4 = scmp.lt.u32.totalorder %s2864_s17, %s2859_s20  ;;  %p2868_p6 = scmp.lt.u32.totalorder %s2859_s20, %s3228_s16 }
  0x5d   : > { %p2862_p7 = pnand %p2860_p11, %p3199_p1 }
  0x5e   : > { %p2867_p5 = por %p2866_p4, %p2865_p2 }
  0x5f   : > { %p2863_p0 = pneg %p2862_p7 }
  0x60   : > { %p2869_p9 = por %p2868_p6, %p2867_p5 }
  0x62   : > { %p2870_p12 = pnand %p2869_p9, %p2863_p0 }
  0x64   : > { %2873 = shalt.err (!%p2870_p12)
}
  0x65   : > { %s2874_s26 = scalar_lea.vmem %s309_s22, 128  ;;  %s3057_s30 = smov [#allocation7]  }
  0x66   : > { %p2875_p3 = scmp.ne.s32.totalorder %s309_s22, %s2874_s26  ;;  %s2879_s14 = sshll.u32 %s3057_s30, 4  ;;  %s2880_s14 = int_to_ptr.vmem [resolvable:$false] %s2879_s14 }
  0x67   : > { %s2881_s23 = scalar_lea.vmem %s2880_s14, 256  ;;  %p2882_p11 = scmp.lt.s32.totalorder %s309_s22, %s2880_s14 }
  0x68   : > { %p2877_p8 = pnand %p2875_p3, %p3199_p1  ;;  %p2883_p7 = scmp.lt.s32.totalorder %s2881_s23, %s2874_s26 }
  0x6a   : > { %p2878_p10 = pneg %p2877_p8  ;;  %p2884_p13 = por %p2883_p7, %p2882_p11 }
  0x6c   : > { %p2885_p2 = pnand %p2884_p13, %p2878_p10 }
  0x6e   : > { %2888 = shalt.err (!%p2885_p2)
}
  0x6f   : > { %p3845_p4 = scmp.ne.s32.totalorder %s3839_s15, 0  ;;  %p3846_p0 = scmp.ne.s32.totalorder %s3843_s18, 0 }
  0x70   : > { %s3297_s29 = sand.u32 (!%p3846_p0), 1, %s3043_s25   ;;  %p3847_p13 = scmp.ne.s32.totalorder (!%p3846_p0), %s3835_s11, 0 }
  0x71   : > { %2697 = dma.hbm_to_vmem [thread:$0]  (!%p3845_p4), %s3228_s16, 128, %s309_s22, %s3193_s8  }
  0x72   : > { %317 = sbr.rel (%p3846_p0) target bundleno = 2980 (0xba4), region = 36  ;;  %s2539_s9 = sshll.u32 (!%p3846_p0), %s3297_s29, 5 }
  0x73   : > { %s320_s27 = scalar_lea.sflag (!%p3846_p0), [#allocation3], %s3297_s29  ;;  %s323_s10 = scalar_lea.vmem (!%p3846_p0), [#allocation2], %s2539_s9 }
  0x79   : > { %3018 = dma.done.wait (%p3847_p13), %s320_s27, 512  }
  0x7a   : > { %3020 = vsyncadd (%p3847_p13), %s320_s27, 4294966784  ;;  %s328_s15 = sand.u32 1, %s3137_s28   ;;  %s3309_s8 = sshll.u32 %s3297_s29, 3 }
  0x7b   : > { %s329_s16 = scalar_lea.sflag [#allocation6], %s328_s15  ;;  %s3314_s18 = scalar_lea.vmem [#allocation5], %s3309_s8 }
  0x7c   : > { %3022 = dma.done.wait (%p3847_p13), %s329_s16, 256  }
  0x7d   : > { %3024 = vsyncadd (%p3847_p13), %s329_s16, 4294967040  ;;  %v3058_v0 = vmov 4   ;;  %v3059_v1 = vmov 0.0   ;;  %s341_s22 = scalar_lea.vmem [#allocation7], %s3309_s8  ;;  %v398_v5 = vld [vmem:[%s323_s10 + $0x8] sm:$0xff]  ;;  %v400_v6 = vld [vmem:[%s323_s10 + $0x18] sm:$0xff]  ;;  %v414_v40 = vlaneseq }
  0x7e   : > { %2761 = vset.pattern.permute.xlu0 %v3058_v0  ;;  %848 = vmatprep.mubr.f32.mxu0 %v3059_v1  ;;  %v3326_v2 = vld [vmem:[%s341_s22] sm:$0xff]  ;;  %v780_v7 = vand.u32 4294901760, %v398_v5  ;;  %v784_v8 = vand.u32 4294901760, %v400_v6  ;;  %v397_v9 = vld [vmem:[%s323_s10] sm:$0xff]  ;;  %s3060_s11 = smov 2   ;;  %s3061_s20 = smov 126  }
  0x7f   : > { %1881 = vmatprep.mubr.f32.mxu1 %v3059_v1  ;;  %v2668_v3 = vtrunc.f32 %v3326_v2  ;;  %v399_v10 = vld [vmem:[%s323_s10 + $0x10] sm:$0xff]  ;;  %v782_v11 = vand.u32 4294901760, %v397_v9  ;;  %v3062_v37 = vmov 0   ;;  %v3063_v38 = vmov 1   ;;  %s3065_s19 = smov 127   ;;  %s2542_s26 = sshll.u32 %s3297_s29, 1 }
  0x80   : > { %v786_v12 = vand.u32 4294901760, %v399_v10  ;;  %v3330_v13 = vpack.c.bf16 %v784_v8, %v780_v7  ;;  %v861_v14 = vsub.f32 %v398_v5, %v780_v7  ;;  %v873_v15 = vsub.f32 %v400_v6, %v784_v8  ;;  %2762 = vset.pattern.permute.xlu1 %v3062_v37  ;;  %s3609_s30 = scalar_lea.vmem [#allocation12], %s2542_s26  ;;  %s382_s14 = scalar_lea.vmem [#allocation9], %s3309_s8 }
  0x81   : > { %v2669_v4 = vcvt.f32.s32 %v2668_v3  ;;  %v867_v17 = vsub.f32 %v397_v9, %v782_v11  ;;  %v3064_v39 = vmov 2   ;;  %v3340_v41 = vand.u32 127, %v414_v40  ;;  %s3660_s23 = scalar_lea.vmem [#allocation8], %s2542_s26  ;;  %s2609_s27 = sshll.u32 %s3137_s28, 7 }
  0x82   : > { %v3332_v16 = vpack.c.bf16 %v786_v12, %v782_v11  ;;  %v879_v18 = vsub.f32 %v399_v10, %v786_v12  ;;  %2613 = vmatprep.subr.bf16.mxu0 %v3330_v13  ;;  %v862_v19 = vand.u32 4294901760, %v861_v14  ;;  %v874_v20 = vand.u32 4294901760, %v873_v15  ;;  %s2291_s10 = sshll.u32 %s382_s14, 4  ;;  %p3852_p5 = scmp.ne.s32.totalorder %s3836_s12, 0  ;;  %s2292_s10 = int_to_ptr.vmem [resolvable:$true] %s2291_s10 }
  0x83   : > { %771 = vperm.xlu0 %2761, %v2669_v4   ;;  %v868_v21 = vand.u32 4294901760, %v867_v17  ;;  %v2620_v33 = vpack.c.bf16 %v873_v15, %v861_v14  ;;  %vm776_vm0 = vcmask 130048   ;;  %v3066_v52 = vmov 3  }
  0x84   : > { %2615 = vmatpush1.bf16.msra.mxu0 %v3332_v16  ;;  %v880_v22 = vand.u32 4294901760, %v879_v18  ;;  %v863_v23 = vsub.f32 %v861_v14, %v862_v19  ;;  %v875_v24 = vsub.f32 %v873_v15, %v874_v20  ;;  %v2622_v34 = vpack.c.bf16 %v879_v18, %v867_v17 }
  0x85   : > { %v869_v25 = vsub.f32 %v867_v17, %v868_v21  ;;  %v2628_v35 = vpack.c.bf16 %v874_v20, %v862_v19  ;;  %vm3067_vm4 = vmmov 1  }
  0x86   : > { %v881_v26 = vsub.f32 %v879_v18, %v880_v22  ;;  %v864_v27 = vand.u32 4294901760, %v863_v23  ;;  %v876_v28 = vand.u32 4294901760, %v875_v24  ;;  %v2630_v36 = vpack.c.bf16 %v880_v22, %v868_v21  ;;  %v2546_v24 = vld [vmem:[%s3314_s18 + $0x1] ss:$4 sm:$0x3] }
  0x87   : > { %478 = vrot.lane.b32.xlu0 %v3326_v2, %s3060_s11  ;;  %v870_v29 = vand.u32 4294901760, %v869_v25  ;;  %v2548_v25 = vld [vmem:[%s3314_s18 + $0x3] ss:$4 sm:$0x3]  ;;  %s3685_s11 = scalar_lea.sflag [#allocation10], %s328_s15 }
  0x88   : > { %v882_v30 = vand.u32 4294901760, %v881_v26  ;;  %v2616_v31 = vpack.c.bf16 %v876_v28, %v864_v27  ;;  %2763 = vset.pattern.permute.xlu0 %v3063_v38  ;;  %v3378_v26 = vadd.f32 %v2548_v25, %v2546_v24  ;;  %v3068_v27 = vmov 5  }
  0x89   : > { %v488_v28 = vsub.f32 %v2548_v25, %v2546_v24 }
  0x8a   : > { %v2618_v32 = vpack.c.bf16 %v882_v30, %v870_v29  ;;  %2617 = vmatprep.subr.bf16.mxu0 %v2616_v31  ;;  %v3383_v31 = vld [vmem:[%s3314_s18] ss:$4 sm:$0x3] }
  0x8b   : > { %604 = vrot.lane.b32.xlu0 %v3326_v2, %s3061_s20  ;;  %v695_v29 = vadd.f32 1e-07, %v488_v28  ;;  %s2889_s20 = scalar_lea.vmem %s2292_s10, 128 }
  0x8c   : > { %p2890_p1 = scmp.ne.s32.totalorder %s2292_s10, %s2889_s20 }
  0x8e   : > { %p2891_p6 = pnand %p2890_p1, %p3852_p5 }
  0x8f   : > { %443 = vperm.xlu0 %2763, %v3326_v2  }
  0x90   : > { %p2892_p9 = pneg %p2891_p6 }
  0x93   : > { %2766 = vset.pattern.permute.xlu0 %v3064_v39 }
 0x102   : > { %v772_v42 = vpop.permute.xlu0 %771 }
 0x103   : > { %vm773_vm1 = vcmp.eq.s32.totalorder %v772_v42, %v3340_v41 }
 0x104   : > { %v3344_v43 = vsel %vm773_vm1, 1.0, %v3059_v1 }
 0x105   : > { %v778_v44 = vsel %vm776_vm0, %v3344_v43, 0 }
 0x106   : > { %v850_v45 = vsub.f32 %v778_v44, %v778_v44  ;;  %v479_v46 = vpop.permute.xlu0 %478 }
 0x107   : > { %v481_v47 = vsub.f32 %v3326_v2, %v479_v46 }
 0x108   : > { %v851_v48 = vand.u32 4294901760, %v850_v45 }
 0x109   : > { %v658_v49 = vadd.f32 1e-07, %v481_v47 }
 0x10a   : > { %v852_v50 = vsub.f32 %v850_v45, %v851_v48  ;;  %v605_v54 = vpop.permute.xlu0 %604 }
 0x10b   : > { %660 = vrot.lane.b32.xlu1 %v658_v49, %s3065_s19  ;;  %v607_v56 = vadd.f32 %v605_v54, %v3326_v2 }
 0x10c   : > { %v853_v51 = vand.u32 4294901760, %v852_v50 }
 0x10d   : > { %v608_v58 = vmul.f32 0.5, %v607_v56 }
 0x10e   : > { %854 = vmatmul.mubr.f32.vlgmr.msra.gmra.mrb[0].mxu0 %v853_v51 }
 0x10f   : > { %483 = vrot.lane.b32.xlu1 %v481_v47, %s3065_s19  ;;  %2619 = vmatpush1.bf16.msra.mxu0 %v2618_v32  ;;  %v3386_v32 = vld [vmem:[%s3314_s18 + $0x2] ss:$4 sm:$0x3]  ;;  %s3070_s19 = smov [#allocation9]  }
 0x110   : > { %944 = vmatprep.mubr.f32.mxu0 %v3059_v1  ;;  %2621 = vmatprep.subr.bf16.mxu0 %v2620_v33  ;;  %v487_v33 = vsub.f32 %v3386_v32, %v3383_v31  ;;  %s2893_s21 = sshll.u32 %s3070_s19, 4  ;;  %s2894_s21 = int_to_ptr.vmem [resolvable:$false] %s2893_s21 }
 0x111   : > { %s2895_s17 = scalar_lea.vmem %s2894_s21, 256  ;;  %p2896_p12 = scmp.lt.s32.totalorder %s2292_s10, %s2894_s21 }
 0x112   : > { %p2897_p3 = scmp.lt.s32.totalorder %s2895_s17, %s2889_s20 }
 0x113   : > { %426 = vperm.xlu1 %2762, %v3326_v2  }
 0x114   : > { %p2898_p8 = por %p2897_p3, %p2896_p12 }
 0x116   : > { %2559 = vmatmul.mubr.msk.f32.vlgmr.msra.gmra.mrb[0].mxu0 %vm776_vm0, %v3344_v43  ;;  %p2899_p10 = pnand %p2898_p8, %p2892_p9 }
 0x117   : > { %2623 = vmatpush1.bf16.msra.mxu0 %v2622_v34  ;;  %1024 = vmatprep.mubr.f32.mxu0 %v3059_v1 }
 0x118   : > { %2625 = vmatprep.subr.bf16.mxu0 %v3330_v13  ;;  %2764 = vset.pattern.permute.xlu1 %v3064_v39 }
 0x119   : > { %451 = vperm.xlu1 %2764, %v3326_v2  }
 0x11d   : > { %2765 = vset.pattern.permute.xlu1 %v3066_v52  ;;  %v3417_v52 = vshrl.u32 %v414_v40, 7 }
 0x11e   : > { %1027 = vmatmul.mubr.f32.vlgmr.msra.gmra.mrb[0].mxu0 %v850_v45  ;;  %457 = vperm.xlu1 %2765, %v3326_v2  }
 0x11f   : > { %2627 = vmatpush1.bf16.msra.mxu0 %v3332_v16  ;;  %1101 = vmatprep.mubr.f32.mxu0 %v3059_v1  ;;  %v3424_v56 = vsub.s32 0, %v3417_v52 }
 0x120   : > { %2629 = vmatprep.subr.bf16.mxu0 %v2628_v35 }
 0x122   : > { %2767 = vset.pattern.permute.xlu1 %v3064_v39 }
 0x126   : > { %1105 = vmatmul.mubr.f32.vlgmr.msra.gmra.mrb[0].mxu0 %v851_v48 }
 0x127   : > { %2631 = vmatpush1.bf16.msra.mxu0 %v2630_v36  ;;  %1187 = vmatprep.mubr.f32.mxu0 %v3059_v1 }
 0x128   : > { %2633 = vmatprep.subr.bf16.mxu0 %v3330_v13 }
 0x12e   : > { %2560 = vmatmul.mubr.msk.f32.vlgmr.msra.gmra.mrb[0].mxu0 %vm776_vm0, %v3344_v43 }
 0x12f   : > { %2635 = vmatpush1.bf16.msra.mxu0 %v3332_v16  ;;  %1263 = vmatprep.mubr.f32.mxu0 %v3059_v1 }
 0x136   : > { %2561 = vmatmul.mubr.msk.f32.vlgmr.msra.gmra.mrb[0].mxu0 %vm776_vm0, %v3344_v43 }
 0x137   : > { %1777 = vmatprep.mubr.f32.mxu0 %v3059_v1 }
 0x17d   : > { %v661_v53 = vpop.permute.xlu1 %660 }
 0x17e   : > { %2772 = vrcp.f32 %v661_v53 }
 0x181   : > { %v484_v55 = vpop.permute.xlu1 %483 }
 0x182   : > { %v486_v57 = vmul.f32 %v484_v55, %v481_v47 }
 0x184   : > { %554 = vperm.xlu0 %2766, %v486_v57  }
 0x188   : > { %v2773_v59 = vpop.eup %2772  ;;  %2769 = vset.pattern.permute.xlu0 %v3063_v38 }
 0x189   : > { %v664_v60 = vmul.f32 %v2773_v59, %v481_v47  ;;  %643 = vperm.xlu0 %2769, %v608_v58  }
 0x18b   : > { %v665_v61 = vand.u32 2147483647, %v664_v60  ;;  %vm692_vm7 = vcmp.lt.f32.partialorder %v664_v60, 0.0  ;;  %v494_v60 = vrot.slane %v3386_v32, %v3424_v56 }
 0x18d   : > { %vm666_vm2 = vcmp.gt.f32.partialorder %v665_v61, 2.4142137  ;;  %v674_v62 = vadd.f32 1.0, %v665_v61  ;;  %2771 = vset.pattern.permute.xlu0 %v3058_v0  ;;  %vm667_vm3 = vcmp.gt.f32.partialorder %v665_v61, 0.41421357  ;;  %v2552_v4 = vadd.f32 -1.0, %v665_v61 }
 0x18e   : > { %v670_v63 = vsel %vm666_vm2, %v665_v61, 1.0  ;;  %vm668_vm5 = vmxor %vm666_vm2, %vm3067_vm4 }
 0x18f   : > { %2774 = vrcp.f32 %v670_v63  ;;  %vm669_vm6 = vmand %vm667_vm3, %vm668_vm5  ;;  %v537_v63 = vrot.slane %v2546_v24, %v3424_v56 }
 0x190   : > { %2776 = vrcp.f32 %v674_v62  ;;  %v679_v17 = vsel %vm669_vm6, 0.7853982, %v3059_v1  ;;  %v524_v62 = vrot.slane %v2548_v25, %v3424_v56 }
 0x191   : > { %v680_v20 = vsel %vm666_vm2, 1.5707964, %v679_v17  ;;  %2778 = vrcp.f32 %v695_v29 }
 0x192   : > { %v3414_v50 = vpop.permute.xlu1 %426 }
 0x198   : > { %v3419_v53 = vpop.permute.xlu1 %451 }
 0x199   : > { %v2775_v3 = vpop.eup %2774 }
 0x19a   : > { %v2777_v5 = vpop.eup %2776  ;;  %v672_v6 = vmul.f32 -1.0, %v2775_v3 }
 0x19b   : > { %v676_v7 = vmul.f32 %v2777_v5, %v2552_v4  ;;  %v2779_v30 = vpop.eup %2778  ;;  %v3439_v4 = vpop.permute.xlu0 %443 }
 0x19c   : > { %v3390_v34 = vmul.f32 %v2779_v30, %v487_v33 }
 0x19d   : > { %v677_v8 = vsel %vm669_vm6, %v676_v7, %v665_v61  ;;  %v507_v61 = vrot.slane %v3383_v31, %v3424_v56  ;;  %v3437_v3 = vpop.permute.xlu1 %457 }
 0x19e   : > { %v678_v9 = vsel %vm666_vm2, %v672_v6, %v677_v8  ;;  %v3393_v35 = vand.u32 2147483647, %v3390_v34  ;;  %vm725_vm12 = vcmp.lt.f32.partialorder %v3390_v34, 0.0  ;;  %v630_v34 = vmul.f32 0.5, %v3378_v26 }
 0x19f   : > { %v681_v10 = vmul.f32 %v678_v9, %v678_v9 }
 0x1a0   : > { %v707_v36 = vadd.f32 1.0, %v3393_v35  ;;  %vm699_vm8 = vcmp.gt.f32.partialorder %v3393_v35, 2.4142137  ;;  %v2555_v38 = vadd.f32 -1.0, %v3393_v35  ;;  %vm700_vm9 = vcmp.gt.f32.partialorder %v3393_v35, 0.41421357 }
 0x1a1   : > { %v682_v0 = vmul.f32 0.080537446, %v681_v10  ;;  %vm701_vm10 = vmxor %vm699_vm8, %vm3067_vm4  ;;  %v635_v26 = vrot.slane %v630_v34, %v3424_v56 }
 0x1a2   : > { %2780 = vrcp.f32 %v707_v36  ;;  %vm3405_vm11 = vmand %vm700_vm9, %vm701_vm10 }
 0x1a3   : > { %v2553_v11 = vadd.f32 -0.13877685, %v682_v0  ;;  %v514_v0 = vmax.f32 %v3414_v50, %v507_v61 }
 0x1a5   : > { %v684_v12 = vmul.f32 %v2553_v11, %v681_v10  ;;  %v531_v11 = vmin.f32 %v3437_v3, %v524_v62 }
 0x1a7   : > { %v685_v13 = vadd.f32 0.19977711, %v684_v12  ;;  %v544_v12 = vmax.f32 %v3439_v4, %v537_v63 }
 0x1a9   : > { %v686_v14 = vmul.f32 %v685_v13, %v681_v10 }
 0x1ab   : > { %v2554_v15 = vadd.f32 -0.3333295, %v686_v14 }
 0x1ac   : > { %v2781_v39 = vpop.eup %2780 }
 0x1ad   : > { %v688_v16 = vmul.f32 %v2554_v15, %v681_v10  ;;  %v709_v44 = vmul.f32 %v2781_v39, %v2555_v38  ;;  %v501_v10 = vmin.f32 %v3419_v53, %v494_v60 }
 0x1af   : > { %v689_v18 = vmul.f32 %v688_v16, %v678_v9  ;;  %v710_v47 = vsel %vm3405_vm11, %v709_v44, %v3393_v35 }
 0x1b1   : > { %v690_v19 = vadd.f32 %v689_v18, %v678_v9  ;;  %v489_v18 = vmul.f32 %v488_v28, %v487_v33 }
 0x1b3   : > { %v691_v21 = vadd.f32 %v690_v19, %v680_v20  ;;  %v516_v19 = vsub.f32 %v501_v10, %v514_v0  ;;  %v546_v20 = vsub.f32 %v531_v11, %v544_v12  ;;  %v578_v0 = vmax.f32 %v3419_v53, %v494_v60 }
 0x1b5   : > { %v693_v22 = vsub.f32 0.0, %v691_v21 }
 0x1b7   : > { %v694_v23 = vsel %vm692_vm7, %v693_v22, %v691_v21 }
 0x1b8   : > { %730 = vperm.xlu1 %2767, %v694_v23  }
 0x1bc   : > { %2768 = vset.pattern.permute.xlu1 %v3062_v37 }
 0x1bd   : > { %622 = vperm.xlu1 %2768, %v608_v58   ;;  %v3429_v58 = vsub.s32 1, %v3417_v52 }
 0x1bf   : > { %v498_v5 = vrot.slane %v3386_v32, %v3429_v58  ;;  %v511_v6 = vrot.slane %v3383_v31, %v3429_v58  ;;  %v528_v7 = vrot.slane %v2548_v25, %v3429_v58  ;;  %v541_v8 = vrot.slane %v2546_v24, %v3429_v58 }
 0x1c0   : > { %v518_v24 = vmax.f32 %v516_v19, 0.0  ;;  %v548_v25 = vmax.f32 %v546_v20, 0.0 }
 0x1c1   : > { %2770 = vset.pattern.permute.xlu1 %v3068_v27  ;;  %v502_v13 = vmin.f32 %v3419_v53, %v498_v5  ;;  %v515_v14 = vmax.f32 %v3414_v50, %v511_v6  ;;  %v532_v15 = vmin.f32 %v3437_v3, %v528_v7  ;;  %v545_v16 = vmax.f32 %v3439_v4, %v541_v8 }
 0x1c2   : > { %473 = vperm.xlu1 %2770, %v3326_v2   ;;  %v703_v2 = vsel %vm699_vm8, %v3393_v35, 1.0  ;;  %v561_v27 = vrot.slane %v489_v18, %v3424_v56  ;;  %v550_v39 = vmul.f32 %v548_v25, %v518_v24  ;;  %v587_v45 = vmax.f32 %v3437_v3, %v528_v7 }
 0x1c3   : > { %2782 = vrcp.f32 %v703_v2  ;;  %v517_v21 = vsub.f32 %v502_v13, %v515_v14  ;;  %v547_v22 = vsub.f32 %v532_v15, %v545_v16  ;;  %v565_v2 = vrot.slane %v489_v18, %v3429_v58 }
 0x1c4   : > { %v581_v13 = vmin.f32 %v3414_v50, %v511_v6  ;;  %v579_v14 = vmax.f32 %v3419_v53, %v498_v5  ;;  %v602_v7 = vadd.f32 %v3386_v32, %v3383_v31 }
 0x1c5   : > { %v519_v30 = vmax.f32 %v517_v21, 0.0  ;;  %v549_v36 = vmax.f32 %v547_v22, 0.0 }
 0x1c6   : > { %v583_v60 = vsub.f32 %v579_v14, %v581_v13 }
 0x1c7   : > { %v551_v44 = vmul.f32 %v549_v36, %v519_v30  ;;  %v603_v30 = vmul.f32 0.5, %v602_v7 }
 0x1c8   : > { %v585_v18 = vmax.f32 %v583_v60, 0.0 }
 0x1ca   : > { %v595_v24 = vmul.f32 %v585_v18, %v585_v18 }
 0x1cd   : > { %v2783_v42 = vpop.eup %2782 }
 0x1ce   : > { %v705_v46 = vmul.f32 -1.0, %v2783_v42 }
 0x1d0   : > { %v711_v48 = vsel %vm699_vm8, %v705_v46, %v710_v47 }
 0x1d1   : > { %v714_v49 = vmul.f32 %v711_v48, %v711_v48 }
 0x1d3   : > { %v715_v51 = vmul.f32 0.080537446, %v714_v49 }
 0x1d5   : > { %v2556_v55 = vadd.f32 -0.13877685, %v715_v51  ;;  %v712_v51 = vsel %vm3405_vm11, 0.7853982, %v3059_v1 }
 0x1d6   : > { %v713_v11 = vsel %vm699_vm8, 1.5707964, %v712_v51  ;;  %v617_v51 = vrot.slane %v603_v30, %v3429_v58 }
 0x1d7   : > { %v717_v59 = vmul.f32 %v2556_v55, %v714_v49  ;;  %v580_v55 = vmin.f32 %v3414_v50, %v507_v61  ;;  %v589_v61 = vmin.f32 %v3439_v4, %v541_v8 }
 0x1d9   : > { %v718_v9 = vadd.f32 0.19977711, %v717_v59  ;;  %v588_v59 = vmin.f32 %v3439_v4, %v537_v63  ;;  %v591_v16 = vsub.f32 %v587_v45, %v589_v61 }
 0x1db   : > { %v719_v17 = vmul.f32 %v718_v9, %v714_v49  ;;  %v593_v6 = vmax.f32 %v591_v16, 0.0 }
 0x1dd   : > { %v2557_v23 = vadd.f32 -0.3333295, %v719_v17  ;;  %v597_v25 = vmul.f32 %v593_v6, %v593_v6 }
 0x1df   : > { %v721_v38 = vmul.f32 %v2557_v23, %v714_v49  ;;  %v586_v49 = vmax.f32 %v3437_v3, %v524_v62  ;;  %v599_v31 = vadd.f32 %v597_v25, %v595_v24 }
 0x1e1   : > { %v722_v28 = vmul.f32 %v721_v38, %v711_v48  ;;  %v590_v63 = vsub.f32 %v586_v49, %v588_v59 }
 0x1e3   : > { %v723_v9 = vadd.f32 %v722_v28, %v711_v48  ;;  %v582_v48 = vsub.f32 %v578_v0, %v580_v55  ;;  %v592_v35 = vmax.f32 %v590_v63, 0.0 }
 0x1e5   : > { %v724_v15 = vadd.f32 %v723_v9, %v713_v11  ;;  %v584_v17 = vmax.f32 %v582_v48, 0.0  ;;  %v596_v20 = vmul.f32 %v592_v35, %v592_v35  ;;  %v601_v11 = vadd.f32 1e-07, %v599_v31 }
 0x1e7   : > { %v726_v62 = vsub.f32 0.0, %v724_v15  ;;  %v594_v5 = vmul.f32 %v584_v17, %v584_v17 }
 0x1e9   : > { %v727_v19 = vsel %vm725_vm12, %v726_v62, %v724_v15 }
 0x1ea   : > { %v737_v21 = vrot.slane %v727_v19, %v3424_v56  ;;  %v741_v22 = vrot.slane %v727_v19, %v3429_v58 }
 0x203   : > { %v555_v29 = vpop.permute.xlu0 %554 }
 0x204   : > { %v568_v42 = vadd.f32 %v561_v27, %v555_v29  ;;  %v569_v46 = vadd.f32 %v565_v2, %v555_v29  ;;  %v598_v27 = vadd.f32 %v596_v20, %v594_v5 }
 0x206   : > { %v570_v33 = vsub.f32 %v568_v42, %v550_v39  ;;  %v571_v47 = vsub.f32 %v569_v46, %v551_v44  ;;  %v600_v28 = vadd.f32 1e-07, %v598_v27 }
 0x208   : > { %v572_v10 = vadd.f32 1e-07, %v570_v33  ;;  %v573_v12 = vadd.f32 1e-07, %v571_v47  ;;  %v613_v47 = vrot.slane %v603_v30, %v3424_v56  ;;  %v644_v49 = vpop.permute.xlu0 %643 }
 0x209   : > { %v3421_v54 = vpop.f32.mrb[0].mxu0  ;;  %v408_v33 = vld [vmem:[%s3812_s2] ss:$2 sm:$0x3]  ;;  %v646_v63 = vsub.f32 %v635_v26, %v644_v49 }
 0x20a   : > { %v3426_v57 = vpop.f32.mrb[1].mxu0  ;;  %2784 = vrcp.f32 %v572_v10  ;;  %v421_v13 = vrot.slane %v408_v33, %v3429_v58 }
 0x20b   : > { %2786 = vrcp.f32 %v573_v12  ;;  %v417_v12 = vrot.slane %v408_v33, %v3424_v56  ;;  %v648_v5 = vmul.f32 %v646_v63, %v646_v63 }
 0x20c   : > { %2788 = vrcp.f32 %v600_v28  ;;  %v430_v18 = vsub.f32 %v421_v13, %v3414_v50 }
 0x20d   : > { %2790 = vrcp.f32 %v601_v11  ;;  %v429_v35 = vsub.f32 %v417_v12, %v3414_v50 }
 0x214   : > { %v2785_v8 = vpop.eup %2784 }
 0x215   : > { %v2787_v23 = vpop.eup %2786  ;;  %v3476_v36 = vmul.f32 %v2785_v8, %v550_v39  ;;  %v639_v39 = vrot.slane %v630_v34, %v3429_v58 }
 0x216   : > { %v3478_v2 = vmul.f32 %v2787_v23, %v551_v44  ;;  %v2549_v44 = vld [vmem:[%s3812_s2 + $0x1] ss:$2 sm:$0x3]  ;;  %v2789_v34 = vpop.eup %2788 }
 0x217   : > { %v750_v9 = vsub.f32 1.0, %v3476_v36  ;;  %v435_v61 = vrot.slane %v2549_v44, %v3424_v56  ;;  %v439_v15 = vrot.slane %v2549_v44, %v3429_v58  ;;  %v647_v17 = vsub.f32 %v639_v39, %v644_v49 }
 0x218   : > { %v751_v10 = vsub.f32 1.0, %v3478_v2  ;;  %v454_v56 = vsub.f32 %v3419_v53, %v417_v12 }
 0x219   : > { %v446_v6 = vsub.f32 %v435_v61, %v3439_v4  ;;  %v447_v19 = vsub.f32 %v439_v15, %v3439_v4  ;;  %v460_v20 = vsub.f32 %v3437_v3, %v435_v61  ;;  %v649_v8 = vmul.f32 %v647_v17, %v647_v17 }
 0x21b   : > { %v448_v24 = vmin.f32 %v429_v35, %v446_v6  ;;  %v462_v25 = vmin.f32 %v454_v56, %v460_v20 }
 0x21d   : > { %v464_v31 = vmin.f32 %v448_v24, %v462_v25 }
 0x21f   : > { %vm466_vm13 = vcmp.gt.f32.partialorder %v464_v31, 1e-09 }
 0x220   : > { %v2550_v49 = vsel %vm466_vm13, 1.0, %v3059_v1 }
 0x237   : > { %v731_v29 = vpop.permute.xlu1 %730 }
 0x238   : > { %v744_v38 = vsub.f32 %v731_v29, %v737_v21  ;;  %v745_v42 = vsub.f32 %v731_v29, %v741_v22  ;;  %v455_v21 = vsub.f32 %v3419_v53, %v421_v13  ;;  %v461_v22 = vsub.f32 %v3437_v3, %v439_v15 }
 0x239   : > { %v449_v29 = vmin.f32 %v430_v18, %v447_v19 }
 0x23a   : > { %v746_v32 = vmul.f32 %v744_v38, %v744_v38  ;;  %v747_v46 = vmul.f32 %v745_v42, %v745_v42  ;;  %v463_v30 = vmin.f32 %v455_v21, %v461_v22  ;;  %v2791_v38 = vpop.eup %2790 }
 0x23c   : > { %v748_v55 = vmul.f32 0.40528473, %v746_v32  ;;  %v749_v59 = vmul.f32 0.40528473, %v747_v46  ;;  %v623_v0 = vpop.permute.xlu1 %622  ;;  %v465_v28 = vmin.f32 %v449_v29, %v463_v30 }
 0x23d   : > { %v625_v48 = vsub.f32 %v613_v47, %v623_v0  ;;  %v626_v62 = vsub.f32 %v617_v51, %v623_v0 }
 0x23e   : > { %v752_v14 = vadd.f32 %v750_v9, %v748_v55  ;;  %v753_v45 = vadd.f32 %v751_v10, %v749_v59  ;;  %vm467_vm14 = vcmp.gt.f32.partialorder %v465_v28, 1e-09 }
 0x23f   : > { %v627_v58 = vmul.f32 %v625_v48, %v625_v48  ;;  %v628_v7 = vmul.f32 %v626_v62, %v626_v62  ;;  %v2551_v12 = vsel %vm467_vm14, 1.0, %v3059_v1  ;;  %v1280_v48 = vcvt.s32.f32 %v3340_v41 }
 0x240   : > { %v754_v60 = vadd.f32 1e-07, %v752_v14  ;;  %v755_v16 = vadd.f32 1e-07, %v753_v45 }
 0x241   : > { %v650_v23 = vadd.f32 %v648_v5, %v627_v58  ;;  %v651_v27 = vadd.f32 %v649_v8, %v628_v7  ;;  %v474_v9 = vpop.permute.xlu1 %473  ;;  %v1284_v35 = vmul.f32 -1e-30, %v1280_v48 }
 0x242   : > { %2792 = vrcp.f32 %v754_v60  ;;  %v3508_v13 = vmul.f32 %v2550_v49, %v474_v9  ;;  %v3510_v45 = vmul.f32 %v2551_v12, %v474_v9 }
 0x243   : > { %2794 = vrcp.f32 %v755_v16  ;;  %v653_v42 = vmul.f32 %v2789_v34, %v650_v23  ;;  %v655_v46 = vmul.f32 %v2791_v38, %v651_v27 }
 0x245   : > { %v656_v39 = vsub.f32 %v3476_v36, %v653_v42  ;;  %v657_v10 = vsub.f32 %v3478_v2, %v655_v46  ;;  %v1279_v36 = vadd.s32 128, %v3340_v41 }
 0x247   : > { %v1281_v60 = vcvt.s32.f32 %v1279_v36 }
 0x249   : > { %v1285_v6 = vmul.f32 -1e-30, %v1281_v60 }
 0x24c   : > { %v2793_v32 = vpop.eup %2792 }
 0x24d   : > { %v2795_v33 = vpop.eup %2794  ;;  %v757_v47 = vmul.f32 %v2793_v32, %v748_v55 }
 0x24e   : > { %v759_v51 = vmul.f32 %v2795_v33, %v749_v59 }
 0x24f   : > { %v760_v26 = vmul.f32 %v757_v47, %v748_v55 }
 0x250   : > { %v761_v44 = vmul.f32 %v759_v51, %v749_v59 }
 0x251   : > { %v762_v0 = vsub.f32 %v656_v39, %v760_v26 }
 0x252   : > { %v763_v11 = vsub.f32 %v657_v10, %v761_v44 }
 0x253   : > { %v764_v14 = vmax.f32 %v762_v0, 0.0 }
 0x254   : > { %v765_v55 = vmax.f32 %v763_v11, 0.0 }
 0x255   : > { %v3513_v61 = vmul.f32 %v764_v14, %v3508_v13 }
 0x256   : > { %v3517_v59 = vmul.f32 %v765_v55, %v3510_v45 }
 0x257   : > { %v1271_v2 = vmul.f32 %v3513_v61, %v3513_v61 }
 0x258   : > { %v1272_v15 = vmul.f32 %v3517_v59, %v3517_v59 }
 0x259   : > { %v1273_v63 = vmul.f32 %v1271_v2, %v1271_v2 }
 0x25a   : > { %v1274_v16 = vmul.f32 %v1272_v15, %v1272_v15 }
 0x25b   : > { %v1275_v62 = vmul.f32 %v1273_v63, %v1271_v2 }
 0x25c   : > { %v1276_v17 = vmul.f32 %v1274_v16, %v1272_v15 }
 0x25d   : > { %v3525_v18 = vmul.f32 %v1275_v62, %v3421_v54 }
 0x25e   : > { %v3528_v19 = vmul.f32 %v1276_v17, %v3426_v57 }
 0x25f   : > { %vm1282_vm15 = vcmp.gt.f32.partialorder %v3525_v18, 0.0 }
 0x260   : > { %vm1283_vm0 = vcmp.gt.f32.partialorder %v3528_v19, 0.0  ;;  %v1286_v56 = vsel %vm1282_vm15, %v3525_v18, %v1284_v35 }
 0x261   : > { %v1287_v41 = vsel %vm1283_vm0, %v3528_v19, %v1285_v6 }
 0x262   : > { %v1288_v58 = vmax.f32 %v1286_v56, %v1287_v41 }
 0x264   : > { %1289 = vmax.xlane.f32.xlu1 %v1288_v58 }
 0x2f1   : > { %v1290_v5 = vpop.xlane.xlu1 %1289 }
 0x2f2   : > { %vm1291_vm1 = vcmp.eq.f32.partialorder %v1286_v56, %v1290_v5  ;;  %vm1292_vm2 = vcmp.eq.f32.partialorder %v1287_v41, %v1290_v5 }
 0x2f3   : > { %v1293_v20 = vsel %vm1291_vm1, -inf, %v1286_v56  ;;  %v1294_v54 = vsel %vm1292_vm2, -inf, %v1287_v41  ;;  %v2562_v57 = vsel %vm1291_vm1, 1.0, %v3059_v1  ;;  %v2563_v21 = vsel %vm1292_vm2, 1.0, %v3059_v1 }
 0x2f4   : > { %v1301_v7 = vmax.f32 %v1293_v20, %v1294_v54 }
 0x2f6   : > { %1302 = vmax.xlane.f32.xlu0 %v1301_v7 }
 0x383   : > { %v1303_v8 = vpop.xlane.xlu0 %1302 }
 0x384   : > { %vm1304_vm3 = vcmp.eq.f32.partialorder %v1293_v20, %v1303_v8  ;;  %vm1305_vm4 = vcmp.eq.f32.partialorder %v1294_v54, %v1303_v8 }
 0x385   : > { %v1306_v22 = vsel %vm1304_vm3, -inf, %v1293_v20  ;;  %v1307_v23 = vsel %vm1305_vm4, -inf, %v1294_v54  ;;  %v2564_v24 = vsel %vm1304_vm3, 1.0, %v3059_v1  ;;  %v2565_v25 = vsel %vm1305_vm4, 1.0, %v3059_v1 }
 0x386   : > { %v1312_v27 = vadd.f32 %v2564_v24, %v2562_v57  ;;  %v1313_v29 = vadd.f32 %v2565_v25, %v2563_v21  ;;  %v1314_v30 = vmax.f32 %v1306_v22, %v1307_v23 }
 0x388   : > { %1315 = vmax.xlane.f32.xlu0 %v1314_v30 }
 0x415   : > { %v1316_v34 = vpop.xlane.xlu0 %1315 }
 0x416   : > { %vm1317_vm5 = vcmp.eq.f32.partialorder %v1306_v22, %v1316_v34  ;;  %vm1318_vm6 = vcmp.eq.f32.partialorder %v1307_v23, %v1316_v34 }
 0x417   : > { %v1319_v38 = vsel %vm1317_vm5, -inf, %v1306_v22  ;;  %v1320_v42 = vsel %vm1318_vm6, -inf, %v1307_v23  ;;  %v2566_v31 = vsel %vm1317_vm5, 1.0, %v3059_v1  ;;  %v2567_v32 = vsel %vm1318_vm6, 1.0, %v3059_v1 }
 0x418   : > { %v1325_v46 = vadd.f32 %v2566_v31, %v1312_v27  ;;  %v1326_v28 = vadd.f32 %v2567_v32, %v1313_v29  ;;  %v1327_v33 = vmax.f32 %v1319_v38, %v1320_v42 }
 0x41a   : > { %1328 = vmax.xlane.f32.xlu1 %v1327_v33 }
 0x4a7   : > { %v1329_v47 = vpop.xlane.xlu1 %1328 }
 0x4a8   : > { %vm1330_vm7 = vcmp.eq.f32.partialorder %v1319_v38, %v1329_v47  ;;  %vm1331_vm8 = vcmp.eq.f32.partialorder %v1320_v42, %v1329_v47 }
 0x4a9   : > { %v1332_v51 = vsel %vm1330_vm7, -inf, %v1319_v38  ;;  %v1333_v26 = vsel %vm1331_vm8, -inf, %v1320_v42  ;;  %v2568_v39 = vsel %vm1330_vm7, 1.0, %v3059_v1  ;;  %v2569_v44 = vsel %vm1331_vm8, 1.0, %v3059_v1 }
 0x4aa   : > { %v1338_v9 = vadd.f32 %v2568_v39, %v1325_v46  ;;  %v1339_v10 = vadd.f32 %v2569_v44, %v1326_v28  ;;  %v1340_v0 = vmax.f32 %v1332_v51, %v1333_v26 }
 0x4ac   : > { %1341 = vmax.xlane.f32.xlu0 %v1340_v0 }
 0x539   : > { %v1342_v49 = vpop.xlane.xlu0 %1341 }
 0x53a   : > { %vm1343_vm9 = vcmp.eq.f32.partialorder %v1332_v51, %v1342_v49  ;;  %vm1344_vm10 = vcmp.eq.f32.partialorder %v1333_v26, %v1342_v49 }
 0x53b   : > { %v1345_v11 = vsel %vm1343_vm9, -inf, %v1332_v51  ;;  %v1346_v12 = vsel %vm1344_vm10, -inf, %v1333_v26  ;;  %v2570_v14 = vsel %vm1343_vm9, 1.0, %v3059_v1  ;;  %v2571_v55 = vsel %vm1344_vm10, 1.0, %v3059_v1 }
 0x53c   : > { %v1351_v36 = vadd.f32 %v2570_v14, %v1338_v9  ;;  %v1352_v2 = vadd.f32 %v2571_v55, %v1339_v10  ;;  %v1353_v15 = vmax.f32 %v1345_v11, %v1346_v12 }
 0x53e   : > { %1354 = vmax.xlane.f32.xlu1 %v1353_v15 }
 0x5cb   : > { %v1355_v48 = vpop.xlane.xlu1 %1354 }
 0x5cc   : > { %vm1356_vm11 = vcmp.eq.f32.partialorder %v1345_v11, %v1355_v48  ;;  %vm1357_vm12 = vcmp.eq.f32.partialorder %v1346_v12, %v1355_v48 }
 0x5cd   : > { %v1358_v63 = vsel %vm1356_vm11, -inf, %v1345_v11  ;;  %v1359_v60 = vsel %vm1357_vm12, -inf, %v1346_v12  ;;  %v2572_v16 = vsel %vm1356_vm11, 1.0, %v3059_v1  ;;  %v2573_v62 = vsel %vm1357_vm12, 1.0, %v3059_v1 }
 0x5ce   : > { %v1364_v17 = vadd.f32 %v2572_v16, %v1351_v36  ;;  %v1365_v35 = vadd.f32 %v2573_v62, %v1352_v2  ;;  %v1366_v6 = vmax.f32 %v1358_v63, %v1359_v60 }
 0x5d0   : > { %1367 = vmax.xlane.f32.xlu0 %v1366_v6  ;;  %v1471_v6 = vrot.slane %v3513_v61, 4 }
 0x65d   : > { %v1368_v56 = vpop.xlane.xlu0 %1367 }
 0x65e   : > { %vm1369_vm13 = vcmp.eq.f32.partialorder %v1358_v63, %v1368_v56  ;;  %vm1370_vm14 = vcmp.eq.f32.partialorder %v1359_v60, %v1368_v56  ;;  %v1477_v56 = vrot.slane %v3517_v59, 4 }
 0x65f   : > { %v1371_v41 = vsel %vm1369_vm13, -inf, %v1358_v63  ;;  %v1372_v58 = vsel %vm1370_vm14, -inf, %v1359_v60  ;;  %v2574_v5 = vsel %vm1369_vm13, 1.0, %v3059_v1  ;;  %v2575_v20 = vsel %vm1370_vm14, 1.0, %v3059_v1 }
 0x660   : > { %v1377_v54 = vadd.f32 %v2574_v5, %v1364_v17  ;;  %v1378_v7 = vadd.f32 %v2575_v20, %v1365_v35  ;;  %v1379_v8 = vmax.f32 %v1371_v41, %v1372_v58 }
 0x662   : > { %1380 = vmax.xlane.f32.xlu1 %v1379_v8 }
 0x6ef   : > { %v1381_v57 = vpop.xlane.xlu1 %1380 }
 0x6f0   : > { %vm1382_vm15 = vcmp.eq.f32.partialorder %v1371_v41, %v1381_v57  ;;  %vm1383_vm0 = vcmp.eq.f32.partialorder %v1372_v58, %v1381_v57 }
 0x6f1   : > { %v1384_v21 = vsel %vm1382_vm15, -inf, %v1371_v41  ;;  %v1385_v22 = vsel %vm1383_vm0, -inf, %v1372_v58  ;;  %v2576_v23 = vsel %vm1382_vm15, 1.0, %v3059_v1  ;;  %v2577_v24 = vsel %vm1383_vm0, 1.0, %v3059_v1 }
 0x6f2   : > { %v1390_v25 = vadd.f32 %v2576_v23, %v1377_v54  ;;  %v1391_v27 = vadd.f32 %v2577_v24, %v1378_v7  ;;  %v1392_v29 = vmax.f32 %v1384_v21, %v1385_v22  ;;  %v1472_v41 = vmax.f32 %v3513_v61, %v1471_v6 }
 0x6f3   : > { %v1478_v58 = vmax.f32 %v3517_v59, %v1477_v56 }
 0x6f4   : > { %1393 = vmax.xlane.f32.xlu0 %v1392_v29  ;;  %v1473_v5 = vrot.slane %v1472_v41, 2 }
 0x6f5   : > { %v1479_v20 = vrot.slane %v1478_v58, 2 }
 0x6f6   : > { %v1474_v57 = vmax.f32 %v1472_v41, %v1473_v5 }
 0x6f7   : > { %v1480_v23 = vmax.f32 %v1478_v58, %v1479_v20 }
 0x781   : > { %v1394_v30 = vpop.xlane.xlu0 %1393 }
 0x782   : > { %vm1395_vm1 = vcmp.eq.f32.partialorder %v1384_v21, %v1394_v30  ;;  %vm1396_vm2 = vcmp.eq.f32.partialorder %v1385_v22, %v1394_v30 }
 0x783   : > { %v1397_v34 = vsel %vm1395_vm1, -inf, %v1384_v21  ;;  %v1398_v38 = vsel %vm1396_vm2, -inf, %v1385_v22  ;;  %v2578_v42 = vsel %vm1395_vm1, 1.0, %v3059_v1  ;;  %v2579_v31 = vsel %vm1396_vm2, 1.0, %v3059_v1 }
 0x784   : > { %v1403_v32 = vadd.f32 %v2578_v42, %v1390_v25  ;;  %v1404_v46 = vadd.f32 %v2579_v31, %v1391_v27  ;;  %v1405_v28 = vmax.f32 %v1397_v34, %v1398_v38  ;;  %v1475_v27 = vrot.slane %v1474_v57, 1 }
 0x785   : > { %v3069_v31 = vmov 1966171168  }
 0x786   : > { %1406 = vmax.xlane.f32.xlu1 %v1405_v28 }
 0x813   : > { %v1407_v33 = vpop.xlane.xlu1 %1406 }
 0x814   : > { %vm1408_vm3 = vcmp.eq.f32.partialorder %v1397_v34, %v1407_v33  ;;  %vm1409_vm4 = vcmp.eq.f32.partialorder %v1398_v38, %v1407_v33  ;;  %v1476_v33 = vmax.f32 %v1474_v57, %v1475_v27 }
 0x815   : > { %v1410_v47 = vsel %vm1408_vm3, -inf, %v1397_v34  ;;  %v1411_v51 = vsel %vm1409_vm4, -inf, %v1398_v38  ;;  %v2580_v26 = vsel %vm1408_vm3, 1.0, %v3059_v1  ;;  %v2581_v39 = vsel %vm1409_vm4, 1.0, %v3059_v1 }
 0x816   : > { %v1416_v44 = vadd.f32 %v2580_v26, %v1403_v32  ;;  %v1417_v9 = vadd.f32 %v2581_v39, %v1404_v46  ;;  %v1418_v10 = vmax.f32 %v1410_v47, %v1411_v51  ;;  %v1481_v34 = vrot.slane %v1480_v23, 1 }
 0x817   : > { %v1625_v32 = vunpack.c.l.s4 %v3069_v31  ;;  %vm1483_vm11 = vcmp.eq.f32.partialorder %v3513_v61, %v1476_v33 }
 0x818   : > { %1419 = vmax.xlane.f32.xlu0 %v1418_v10  ;;  %v2588_v10 = vsel %vm1483_vm11, 1.0, %v3059_v1 }
 0x819   : > { %v1626_v39 = vunpack.c.0.s8 %v1625_v32 }
 0x8a5   : > { %v1420_v0 = vpop.xlane.xlu0 %1419 }
 0x8a6   : > { %vm1421_vm5 = vcmp.eq.f32.partialorder %v1410_v47, %v1420_v0  ;;  %vm1422_vm6 = vcmp.eq.f32.partialorder %v1411_v51, %v1420_v0 }
 0x8a7   : > { %v1423_v49 = vsel %vm1421_vm5, -inf, %v1410_v47  ;;  %v1424_v11 = vsel %vm1422_vm6, -inf, %v1411_v51  ;;  %v2582_v12 = vsel %vm1421_vm5, 1.0, %v3059_v1  ;;  %v2583_v14 = vsel %vm1422_vm6, 1.0, %v3059_v1 }
 0x8a8   : > { %v1429_v55 = vadd.f32 %v2582_v12, %v1416_v44  ;;  %v1430_v36 = vadd.f32 %v2583_v14, %v1417_v9  ;;  %v1431_v2 = vmax.f32 %v1423_v49, %v1424_v11  ;;  %v1482_v47 = vmax.f32 %v1480_v23, %v1481_v34 }
 0x8a9   : > { %vm3602_vm5 = vcmp.lt.s32.totalorder %v414_v40, 256 }
 0x8aa   : > { %1432 = vmax.xlane.f32.xlu1 %v1431_v2  ;;  %vm1484_vm12 = vcmp.eq.f32.partialorder %v3517_v59, %v1482_v47 }
 0x8ab   : > { %v2589_v0 = vsel %vm1484_vm12, 1.0, %v3059_v1 }
 0x937   : > { %v1433_v15 = vpop.xlane.xlu1 %1432 }
 0x938   : > { %vm1434_vm7 = vcmp.eq.f32.partialorder %v1423_v49, %v1433_v15  ;;  %vm1435_vm8 = vcmp.eq.f32.partialorder %v1424_v11, %v1433_v15 }
 0x939   : > { %v2584_v48 = vsel %vm1434_vm7, 1.0, %v3059_v1  ;;  %v2585_v63 = vsel %vm1435_vm8, 1.0, %v3059_v1  ;;  %v1436_v60 = vsel %vm1434_vm7, -inf, %v1423_v49  ;;  %v1437_v16 = vsel %vm1435_vm8, -inf, %v1424_v11 }
 0x93a   : > { %v1442_v62 = vadd.f32 %v2584_v48, %v1429_v55  ;;  %v1443_v17 = vadd.f32 %v2585_v63, %v1430_v36  ;;  %v1444_v35 = vmax.f32 %v1436_v60, %v1437_v16  ;;  %v3575_v49 = vsub.s32 %v1626_v39, %v3417_v52 }
 0x93c   : > { %1445 = vmax.xlane.f32.xlu0 %v1444_v35 }
 0x9c9   : > { %v1446_v54 = vpop.xlane.xlu0 %1445 }
 0x9ca   : > { %vm1447_vm9 = vcmp.eq.f32.partialorder %v1436_v60, %v1446_v54  ;;  %vm1448_vm10 = vcmp.eq.f32.partialorder %v1437_v16, %v1446_v54 }
 0x9cb   : > { %v2586_v7 = vsel %vm1447_vm9, 1.0, %v3059_v1  ;;  %v2587_v8 = vsel %vm1448_vm10, 1.0, %v3059_v1 }
 0x9cc   : > { %v1453_v21 = vadd.f32 %v2586_v7, %v1442_v62  ;;  %v1454_v22 = vadd.f32 %v2587_v8, %v1443_v17 }
 0x9ce   : > { %v1455_v24 = vmul.f32 %v1453_v21, %v3508_v13  ;;  %v1456_v25 = vmul.f32 %v1454_v22, %v3510_v45 }
 0x9d0   : > { %v1457_v29 = vrot.slane %v1455_v24, 4  ;;  %v1463_v30 = vrot.slane %v1456_v25, 4 }
 0x9d2   : > { %v1458_v38 = vadd.f32 %v1457_v29, %v1455_v24  ;;  %v1464_v42 = vadd.f32 %v1463_v30, %v1456_v25 }
 0x9d4   : > { %v1459_v46 = vrot.slane %v1458_v38, 2  ;;  %v1465_v28 = vrot.slane %v1464_v42, 2 }
 0x9d6   : > { %v1460_v51 = vadd.f32 %v1459_v46, %v1458_v38  ;;  %v1466_v26 = vadd.f32 %v1465_v28, %v1464_v42 }
 0x9d8   : > { %v1461_v44 = vrot.slane %v1460_v51, 1  ;;  %v1467_v9 = vrot.slane %v1466_v26, 1 }
 0x9da   : > { %v3568_v13 = vadd.f32 %v1461_v44, %v1460_v51  ;;  %v3570_v45 = vadd.f32 %v1467_v9, %v1466_v26 }
 0x9dc   : > { %vm1489_vm13 = vcmp.gt.f32.partialorder %v3568_v13, 1.0  ;;  %vm1490_vm14 = vcmp.gt.f32.partialorder %v3570_v45, 1.0  ;;  %vm1470_vm15 = vcmp.gt.f32.partialorder %v3570_v45, 0.0  ;;  %vm1469_vm0 = vcmp.gt.f32.partialorder %v3568_v13, 0.0 }
 0x9dd   : > { %v1495_v11 = vsel %vm1489_vm13, %v2588_v10, %v1455_v24  ;;  %v1496_v12 = vsel %vm1490_vm14, %v2589_v0, %v1456_v25  ;;  %v2230_v14 = vsel %vm1470_vm15, 1, %v3062_v37  ;;  %v2229_v55 = vsel %vm1469_vm0, 1, %v3062_v37 }
 0x9de   : > { %vm1500_vm1 = vcmp.gt.f32.partialorder %v1496_v12, 0.5  ;;  %v1648_v36 = vmul.f32 %v1495_v11, %v3513_v61  ;;  %v1649_v2 = vmul.f32 %v1496_v12, %v3517_v59  ;;  %vm1499_vm2 = vcmp.gt.f32.partialorder %v1495_v11, 0.5 }
 0x9df   : > { %v1502_v15 = vsel %vm1500_vm1, %v3417_v52, 8  ;;  %v1501_v48 = vsel %vm1499_vm2, %v3417_v52, 8  ;;  %v3592_v63 = vmul.f32 %v1495_v11, %v3525_v18  ;;  %v3595_v60 = vmul.f32 %v1496_v12, %v3528_v19 }
 0x9e0   : > { %v1512_v16 = vrot.slane %v1502_v15, 4  ;;  %v1650_v62 = vmax.f32 %v1648_v36, %v1649_v2  ;;  %v1503_v17 = vrot.slane %v1501_v48, 4  ;;  %v2231_v37 = vcombine.low %v2229_v55, %v2230_v14  ;;  %v2798_v2 = vld [vmem:[%s341_s22] sm:$0xff]  ;;  %s3681_s22 = scalar_lea.hbm %s3815_s5, %s2609_s27 }
 0x9e1   : > { %v1645_v61 = vmax.f32 %v3592_v63, %v3595_v60  ;;  %vm1587_vm14 = vcmask 1040384   ;;  %vm1590_vm1 = vcmask 1041408   ;;  %vm1593_vm2 = vcmask 1042432  }
 0x9e2   : > { %vm1513_vm3 = vcmp.lt.s32.totalorder %v1502_v15, %v1512_v16  ;;  %1651 = vmax.xlane.f32.xlu0 %v1650_v62  ;;  %vm1504_vm4 = vcmp.lt.s32.totalorder %v1501_v48, %v1503_v17  ;;  %v2238_v59 = vrot.slane %v2231_v37, %v3575_v49 }
 0x9e3   : > { %v1514_v35 = vsel %vm1513_vm3, %v1502_v15, %v1512_v16  ;;  %v1505_v18 = vsel %vm1504_vm4, %v1501_v48, %v1503_v17  ;;  %1646 = vmax.xlane.f32.xlu1 %v1645_v61 }
 0x9e4   : > { %v1515_v6 = vrot.slane %v1514_v35, 2  ;;  %v1506_v56 = vrot.slane %v1505_v18, 2  ;;  %v2245_v41 = vrot.slane %v2238_v59, %v3575_v49 }
 0x9e6   : > { %vm1516_vm6 = vcmp.lt.s32.totalorder %v1514_v35, %v1515_v6  ;;  %vm1507_vm7 = vcmp.lt.s32.totalorder %v1505_v18, %v1506_v56  ;;  %2246 = vst.msk [vmem:[%s3609_s30] sm:$0x3] %vm3602_vm5, %v2245_v41 }
 0x9e7   : > { %v1517_v58 = vsel %vm1516_vm6, %v1514_v35, %v1515_v6  ;;  %v1508_v5 = vsel %vm1507_vm7, %v1505_v18, %v1506_v56 }
 0x9e8   : > { %v1518_v20 = vrot.slane %v1517_v58, 1  ;;  %v1509_v40 = vrot.slane %v1508_v5, 1 }
 0x9ea   : > { %vm1519_vm8 = vcmp.lt.s32.totalorder %v1517_v58, %v1518_v20  ;;  %vm1510_vm9 = vcmp.lt.s32.totalorder %v1508_v5, %v1509_v40 }
 0x9eb   : > { %v1520_v54 = vsel %vm1519_vm8, %v1517_v58, %v1518_v20  ;;  %v1511_v7 = vsel %vm1510_vm9, %v1508_v5, %v1509_v40 }
 0x9ec   : > { %vm1522_vm10 = vcmp.eq.s32.totalorder %v1520_v54, 8  ;;  %vm1521_vm11 = vcmp.eq.s32.totalorder %v1511_v7, 8 }
 0x9ed   : > { %v1524_v8 = vsel %vm1522_vm10, 0, %v1520_v54  ;;  %v1523_v57 = vsel %vm1521_vm11, 0, %v1511_v7 }
 0x9ee   : > { %vm1526_vm12 = vcmp.eq.s32.totalorder %v3417_v52, %v1524_v8  ;;  %vm1525_vm13 = vcmp.eq.s32.totalorder %v3417_v52, %v1523_v57 }
 0x9ef   : > { %v3617_v21 = vsel %vm1526_vm12, 1.0, %v3059_v1  ;;  %v3620_v22 = vsel %vm1525_vm13, 1.0, %v3059_v1 }
 0x9f0   : > { %v1532_v23 = vmul.f32 %v3617_v21, %v3414_v50  ;;  %v1546_v24 = vmul.f32 %v3617_v21, %v3439_v4  ;;  %v1560_v25 = vmul.f32 %v3617_v21, %v3419_v53  ;;  %v1574_v27 = vmul.f32 %v3617_v21, %v3437_v3 }
 0x9f1   : > { %v1531_v52 = vmul.f32 %v3620_v22, %v3414_v50  ;;  %v1545_v29 = vmul.f32 %v3620_v22, %v3439_v4  ;;  %v1559_v30 = vmul.f32 %v3620_v22, %v3419_v53  ;;  %v1573_v34 = vmul.f32 %v3620_v22, %v3437_v3 }
 0x9f2   : > { %v1539_v38 = vrot.slane %v1532_v23, 4  ;;  %v1553_v42 = vrot.slane %v1546_v24, 4  ;;  %v1567_v31 = vrot.slane %v1560_v25, 4  ;;  %v1581_v32 = vrot.slane %v1574_v27, 4 }
 0x9f3   : > { %v1533_v46 = vrot.slane %v1531_v52, 4  ;;  %v1547_v28 = vrot.slane %v1545_v29, 4  ;;  %v1561_v33 = vrot.slane %v1559_v30, 4  ;;  %v1575_v47 = vrot.slane %v1573_v34, 4 }
 0x9f4   : > { %v1540_v51 = vadd.f32 %v1539_v38, %v1532_v23  ;;  %v1554_v50 = vadd.f32 %v1553_v42, %v1546_v24  ;;  %v1568_v26 = vadd.f32 %v1567_v31, %v1560_v25  ;;  %v1582_v4 = vadd.f32 %v1581_v32, %v1574_v27 }
 0x9f5   : > { %v1534_v39 = vadd.f32 %v1533_v46, %v1531_v52  ;;  %v1548_v44 = vadd.f32 %v1547_v28, %v1545_v29  ;;  %v1562_v53 = vadd.f32 %v1561_v33, %v1559_v30  ;;  %v1576_v9 = vadd.f32 %v1575_v47, %v1573_v34 }
 0x9f6   : > { %v1541_v10 = vrot.slane %v1540_v51, 2  ;;  %v1555_v3 = vrot.slane %v1554_v50, 2  ;;  %v1569_v0 = vrot.slane %v1568_v26, 2  ;;  %v1583_v11 = vrot.slane %v1582_v4, 2 }
 0x9f7   : > { %v1535_v12 = vrot.slane %v1534_v39, 2  ;;  %v1549_v14 = vrot.slane %v1548_v44, 2  ;;  %v1563_v55 = vrot.slane %v1562_v53, 2  ;;  %v1577_v36 = vrot.slane %v1576_v9, 2 }
 0x9f8   : > { %1602 = vperm.xlu0 %2771, %v2798_v2   ;;  %v1542_v15 = vadd.f32 %v1541_v10, %v1540_v51  ;;  %v1556_v48 = vadd.f32 %v1555_v3, %v1554_v50  ;;  %v1570_v16 = vadd.f32 %v1569_v0, %v1568_v26  ;;  %v1584_v62 = vadd.f32 %v1583_v11, %v1582_v4 }
 0x9f9   : > { %v1536_v17 = vadd.f32 %v1535_v12, %v1534_v39  ;;  %v1550_v37 = vadd.f32 %v1549_v14, %v1548_v44  ;;  %v1564_v61 = vadd.f32 %v1563_v55, %v1562_v53  ;;  %v1578_v59 = vadd.f32 %v1577_v36, %v1576_v9 }
 0x9fa   : > { %v1543_v35 = vrot.slane %v1542_v15, 1  ;;  %v1557_v18 = vrot.slane %v1556_v48, 1  ;;  %v1571_v6 = vrot.slane %v1570_v16, 1  ;;  %v1585_v56 = vrot.slane %v1584_v62, 1 }
 0x9fb   : > { %v1537_v41 = vrot.slane %v1536_v17, 1  ;;  %v1551_v58 = vrot.slane %v1550_v37, 1  ;;  %v1565_v5 = vrot.slane %v1564_v61, 1  ;;  %v1579_v20 = vrot.slane %v1578_v59, 1 }
 0x9fc   : > { %v1544_v40 = vadd.f32 %v1543_v35, %v1542_v15  ;;  %v1558_v54 = vadd.f32 %v1557_v18, %v1556_v48  ;;  %v1572_v7 = vadd.f32 %v1571_v6, %v1570_v16  ;;  %v1586_v24 = vadd.f32 %v1585_v56, %v1584_v62 }
 0x9fd   : > { %v1538_v8 = vadd.f32 %v1537_v41, %v1536_v17  ;;  %v1552_v57 = vadd.f32 %v1551_v58, %v1550_v37  ;;  %v1566_v23 = vadd.f32 %v1565_v5, %v1564_v61  ;;  %v1580_v27 = vadd.f32 %v1579_v20, %v1578_v59 }
 0x9fe   : > { %v1589_v25 = vsel %vm1587_vm14, %v1544_v40, %v1558_v54 }
 0x9ff   : > { %v1588_v52 = vsel %vm1587_vm14, %v1538_v8, %v1552_v57  ;;  %v1592_v29 = vsel %vm1590_vm1, %v1589_v25, %v1572_v7 }
 0xa00   : > { %v1591_v30 = vsel %vm1590_vm1, %v1588_v52, %v1566_v23  ;;  %v1595_v34 = vsel %vm1593_vm2, %v1592_v29, %v1586_v24 }
 0xa01   : > { %v1594_v38 = vsel %vm1593_vm2, %v1591_v30, %v1580_v27 }
 0xa02   : > { %v1598_v42 = vcombine.low %v1594_v38, %v1595_v34 }
 0xa04   : > { %1600 = vst [vmem:[%s382_s14] sm:$0xff] %v1598_v42 }
 0xa16   : > { %1670 = vxpose.xlu1.b32.start.end [1/1] (short) (narrow) %v3344_v43, 16 }
 0xa6f   : > { %v1652_v46 = vpop.xlane.xlu0 %1651 }
 0xa70   : > { %v1647_v31 = vpop.xlane.xlu1 %1646 }
 0xa71   : > { %v1653_v32 = vadd.f32 1e-09, %v1647_v31 }
 0xa73   : > { %2796 = vrcp.f32 %v1653_v32 }
 0xa77   : > { %v1603_v28 = vpop.permute.xlu0 %1602 }
 0xa78   : > { %v1605_v33 = vmul.f32 %v3620_v22, %v1603_v28  ;;  %v1606_v47 = vmul.f32 %v3617_v21, %v1603_v28 }
 0xa7a   : > { %v1607_v51 = vrot.slane %v1605_v33, 4  ;;  %v1613_v50 = vrot.slane %v1606_v47, 4 }
 0xa7c   : > { %v1608_v26 = vadd.f32 %v1607_v51, %v1605_v33  ;;  %v1614_v4 = vadd.f32 %v1613_v50, %v1606_v47 }
 0xa7d   : > { %v2797_v39 = vpop.eup %2796 }
 0xa7e   : > { %v1655_v44 = vmul.f32 %v2797_v39, %v1652_v46  ;;  %v1609_v53 = vrot.slane %v1608_v26, 2  ;;  %v1615_v9 = vrot.slane %v1614_v4, 2 }
 0xa80   : > { %v1656_v10 = vmul.f32 %v1655_v44, %v3592_v63  ;;  %v1657_v43 = vmul.f32 %v1655_v44, %v3595_v60  ;;  %v1610_v3 = vadd.f32 %v1609_v53, %v1608_v26  ;;  %v1616_v0 = vadd.f32 %v1615_v9, %v1614_v4 }
 0xa82   : > { %v1658_v11 = vrot.slane %v1656_v10, 4  ;;  %v1664_v12 = vrot.slane %v1657_v43, 4  ;;  %v1611_v14 = vrot.slane %v1610_v3, 1  ;;  %v1617_v55 = vrot.slane %v1616_v0, 1 }
 0xa84   : > { %v1612_v36 = vadd.f32 %v1611_v14, %v1610_v3  ;;  %v1618_v2 = vadd.f32 %v1617_v55, %v1616_v0  ;;  %v1665_v15 = vmax.f32 %v1657_v43, %v1664_v12  ;;  %v1659_v48 = vmax.f32 %v1656_v10, %v1658_v11 }
 0xa86   : > { %v1619_v16 = vsel %vm1469_vm0, %v1612_v36, 16.0  ;;  %v1620_v62 = vsel %vm1470_vm15, %v1618_v2, 16.0  ;;  %v1666_v17 = vrot.slane %v1665_v15, 2  ;;  %v1660_v63 = vrot.slane %v1659_v48, 2 }
 0xa87   : > { %v2670_v37 = vtrunc.f32 %v1619_v16  ;;  %v2672_v60 = vtrunc.f32 %v1620_v62  ;;  %vm1704_vm15 = vcmask 64512  }
 0xa88   : > { %v1667_v61 = vmax.f32 %v1665_v15, %v1666_v17  ;;  %v1661_v59 = vmax.f32 %v1659_v48, %v1660_v63 }
 0xa89   : > { %v2671_v35 = vcvt.f32.s32 %v2670_v37  ;;  %v2673_v18 = vcvt.f32.s32 %v2672_v60 }
 0xa8a   : > { %v1668_v6 = vrot.slane %v1667_v61, 1  ;;  %v1662_v56 = vrot.slane %v1661_v59, 1 }
 0xa8b   : > { %v1623_v41 = vcombine.low %v2671_v35, %v2673_v18 }
 0xa8c   : > { %v1669_v58 = vmax.f32 %v1667_v61, %v1668_v6  ;;  %v1663_v5 = vmax.f32 %v1661_v59, %v1662_v56 }
 0xa8d   : > { %v1630_v13 = vrot.slane %v1623_v41, %v3575_v49 }
 0xa8e   : > { %v1703_v20 = vmul.f32 %v3617_v21, %v1669_v58  ;;  %v1702_v45 = vmul.f32 %v3620_v22, %v1663_v5 }
 0xa8f   : > { %v1637_v40 = vrot.slane %v1630_v13, %v3575_v49 }
 0xa90   : > { %v1711_v54 = vand.u32 4294901760, %v1703_v20  ;;  %v1713_v7 = vand.u32 4294901760, %v1702_v45 }
 0xa91   : > { %1642 = vst.msk [vmem:[%s3660_s23] sm:$0x3] %vm3602_vm5, %v1637_v40 }
 0xa92   : > { %1712 = vmatprep.subr.mxu0 %v1711_v54  ;;  %v1801_v8 = vsub.f32 %v1703_v20, %v1711_v54  ;;  %v1807_v57 = vsub.f32 %v1702_v45, %v1713_v7 }
 0xa93   : > { %1714 = vmatpush1.msra.mxu0 %v1713_v7 }
 0xa94   : > { %v1802_v23 = vand.u32 4294901760, %v1801_v8  ;;  %v1808_v21 = vand.u32 4294901760, %v1807_v57 }
 0xa96   : > { %v1686_v24 = vpop.trf.xlu1  ;;  %v1803_v22 = vsub.f32 %v1801_v8, %v1802_v23  ;;  %v1809_v25 = vsub.f32 %v1807_v57, %v1808_v21 }
 0xa97   : > { %v1706_v49 = vsel %vm1704_vm15, %v1686_v24, 0 }
 0xa98   : > { %v1778_v27 = vand.u32 4294901760, %v1706_v49  ;;  %v1804_v52 = vand.u32 4294901760, %v1803_v22  ;;  %v1810_v29 = vand.u32 4294901760, %v1809_v25 }
 0xa9a   : > { %v1779_v30 = vsub.f32 %v1706_v49, %v1778_v27  ;;  %2636 = vmatprep.subr.mxu1 %v1804_v52  ;;  %v1687_v34 = vpop.trf.xlu1  ;;  %1805 = vmatprep.subr.mxu0 %v1804_v52 }
 0xa9b   : > { %v1709_v19 = vsel %vm1704_vm15, %v1687_v34, 0  ;;  %2637 = vmatpush1.msra.mxu1 %v1810_v29 }
 0xa9c   : > { %v1780_v38 = vand.u32 4294901760, %v1779_v30  ;;  %v1789_v42 = vand.u32 4294901760, %v1709_v19  ;;  %1891 = vmatprep.subr.mxu1 %v1801_v8 }
 0xa9e   : > { %v1781_v31 = vsub.f32 %v1779_v30, %v1780_v38  ;;  %v1790_v32 = vsub.f32 %v1709_v19, %v1789_v42  ;;  %1883 = vmatmul.mubr.f32.vlgmr.msra.gmra.mrb[0].mxu1 %v1789_v42 }
 0xa9f   : > { %1894 = vmatpush1.msra.mxu1 %v1807_v57  ;;  %1957 = vmatprep.mubr.f32.mxu1 %v3059_v1 }
 0xaa0   : > { %v1782_v46 = vand.u32 4294901760, %v1781_v31  ;;  %v1791_v28 = vand.u32 4294901760, %v1790_v32  ;;  %1975 = vmatprep.subr.mxu1 %v1711_v54 }
 0xaa2   : > { %1783 = vmatmul.mubr.f32.vlgmr.msra.gmra.mrb[2].mxu0 %v1782_v46  ;;  %1960 = vmatmul.mubr.f32.vlgmr.msra.gmra.mrb[2].mxu1 %v1779_v30  ;;  %v1792_v33 = vsub.f32 %v1790_v32, %v1791_v28 }
 0xaa3   : > { %1811 = vmatpush1.msra.mxu0 %v1810_v29  ;;  %1977 = vmatpush1.msra.mxu1 %v1713_v7 }
 0xaa4   : > { %2062 = vmatprep.subr.mxu1 %v1802_v23  ;;  %1788 = vmatprep.mubr.f32.mxu0 %v3059_v1  ;;  %v1793_v47 = vand.u32 4294901760, %v1792_v33 }
 0xaa5   : > { %1965 = vmatprep.mubr.f32.mxu1 %v3059_v1 }
 0xaa6   : > { %1794 = vmatmul.mubr.f32.gmra.mrb[4].mxu0 %v1793_v47  ;;  %1968 = vmatmul.mubr.f32.gmra.mrb[0].mxu1 %v1790_v32 }
 0xaa7   : > { %1874 = vmatprep.mubr.f32.mxu0 %v3059_v1  ;;  %2040 = vmatprep.mubr.f32.mxu1 %v3059_v1 }
 0xaaa   : > { %1876 = vmatmul.mubr.f32.vlgmr.msra.gmra.mrb[2].mxu0 %v1778_v27  ;;  %2044 = vmatmul.mubr.f32.vlgmr.msra.gmra.mrb[2].mxu1 %v1780_v38 }
 0xaab   : > { %2066 = vmatpush1.msra.mxu1 %v1808_v21  ;;  %2049 = vmatprep.mubr.f32.mxu1 %v3059_v1 }
 0xaac   : > { %2145 = vmatprep.subr.mxu1 %v1711_v54 }
 0xaae   : > { %2053 = vmatmul.mubr.f32.gmra.mrb[0].mxu1 %v1791_v28 }
 0xaaf   : > { %2129 = vmatprep.mubr.f32.mxu1 %v3059_v1 }
 0xab2   : > { %2131 = vmatmul.mubr.f32.vlgmr.msra.gmra.mrb[2].mxu1 %v1778_v27 }
 0xab3   : > { %2147 = vmatpush1.msra.mxu1 %v1713_v7  ;;  %2136 = vmatprep.mubr.f32.mxu1 %v3059_v1 }
 0xab6   : > { %2138 = vmatmul.mubr.f32.gmra.mrb[0].mxu1 %v1789_v42 }
 0xab7   : > { %2210 = vmatprep.mubr.f32.mxu1 %v3059_v1 }
 0xaba   : > { %2212 = vmatmul.mubr.f32.vlgmr.msra.gmra.mrb[2].mxu1 %v1778_v27 }
 0xabb   : > { %2217 = vmatprep.mubr.f32.mxu1 %v3059_v1 }
 0xabe   : > { %2219 = vmatmul.mubr.f32.gmra.mrb[0].mxu1 %v1789_v42 }
 0xabf   : > { %2902 = shalt.err (!%p2899_p10)
}
 0xac0   : > { %s2903_s15 = scalar_lea.hbm %s3681_s22, 128  ;;  %s2907_s13 = scalar_lea.hbm %s3815_s5, 256 }
 0xac1   : > { %p2904_p11 = scmp.ne.s32.totalorder %s3681_s22, %s2903_s15  ;;  %p2908_p4 = scmp.lt.u32.totalorder %s3681_s22, %s3815_s5 }
 0xac2   : > { %p2909_p0 = scmp.lt.u32.totalorder %s2907_s13, %s2903_s15  ;;  %p2911_p1 = scmp.lt.u32.totalorder %s2903_s15, %s3681_s22 }
 0xac3   : > { %p2905_p7 = pnand %p2904_p11, %p3852_p5 }
 0xac4   : > { %p2910_p13 = por %p2909_p0, %p2908_p4 }
 0xac5   : > { %p2906_p2 = pneg %p2905_p7 }
 0xac6   : > { %p2912_p6 = por %p2911_p1, %p2910_p13 }
 0xac8   : > { %p2913_p9 = pnand %p2912_p6, %p2906_p2 }
 0xaca   : > { %2916 = shalt.err (!%p2913_p9)
}
 0xacb   : > { %2681 = dma.vmem_to_hbm [thread:$0]  (%p3852_p5), %s2292_s10, 128, %s3681_s22, %s3685_s11  }
 0xacc   : > { %s2608_s27 = sshll.u32 %s3137_s28, 5  ;;  %s2277_s16 = sshll.u32 %s3660_s23, 4  ;;  %s2278_s16 = int_to_ptr.vmem [resolvable:$true] %s2277_s16 }
 0xacd   : > { %s3712_s19 = scalar_lea.hbm %s3814_s4, %s2608_s27  ;;  %s2248_s21 = scalar_lea.sflag [#allocation4], %s3297_s29 }
 0xace   : > { %s2917_s17 = scalar_lea.vmem %s2278_s16, 32  ;;  %s3071_s15 = smov [#allocation8]  }
 0xacf   : > { %p2918_p12 = scmp.ne.s32.totalorder %s2278_s16, %s2917_s17  ;;  %s2921_s8 = sshll.u32 %s3071_s15, 4  ;;  %s2922_s8 = int_to_ptr.vmem [resolvable:$false] %s2921_s8 }
 0xad0   : > { %s2923_s1 = scalar_lea.vmem %s2922_s8, 64  ;;  %p2924_p10 = scmp.lt.s32.totalorder %s2278_s16, %s2922_s8 }
 0xad1   : > { %p2919_p3 = pnand %p2918_p12, %p3852_p5  ;;  %p2925_p11 = scmp.lt.s32.totalorder %s2923_s1, %s2917_s17 }
 0xad3   : > { %p2920_p8 = pneg %p2919_p3  ;;  %p2926_p7 = por %p2925_p11, %p2924_p10 }
 0xad5   : > { %p2927_p2 = pnand %p2926_p7, %p2920_p8 }
 0xad7   : > { %2930 = shalt.err (!%p2927_p2)
}
 0xad8   : > { %s2931_s23 = scalar_lea.hbm %s3712_s19, 32  ;;  %s2935_s13 = scalar_lea.hbm %s3814_s4, 64 }
 0xad9   : > { %p2932_p4 = scmp.ne.s32.totalorder %s3712_s19, %s2931_s23  ;;  %p2936_p1 = scmp.lt.u32.totalorder %s3712_s19, %s3814_s4 }
 0xada   : > { %p2937_p6 = scmp.lt.u32.totalorder %s2935_s13, %s2931_s23  ;;  %p2939_p12 = scmp.lt.u32.totalorder %s2931_s23, %s3712_s19 }
 0xadb   : > { %p2933_p0 = pnand %p2932_p4, %p3852_p5 }
 0xadc   : > { %p2938_p9 = por %p2937_p6, %p2936_p1 }
 0xadd   : > { %p2934_p13 = pneg %p2933_p0 }
 0xade   : > { %p2940_p3 = por %p2939_p12, %p2938_p9 }
 0xae0   : > { %p2941_p8 = pnand %p2940_p3, %p2934_p13 }
 0xae2   : > { %2944 = shalt.err (!%p2941_p8)
}
 0xae3   : > { %2680 = dma.vmem_to_hbm [thread:$0]  (%p3852_p5), %s2278_s16, 32, %s3712_s19, %s2248_s21  }
 0xae4   : > { %s3737_s17 = scalar_lea.hbm %s3817_s7, %s2608_s27  ;;  %s2321_s15 = sshll.u32 %s3609_s30, 4  ;;  %s2322_s15 = int_to_ptr.vmem [resolvable:$true] %s2321_s15 }
 0xae5   : > { %s2263_s8 = scalar_lea.sflag [#allocation13], %s3297_s29  ;;  %s2945_s1 = scalar_lea.vmem %s2322_s15, 32 }
 0xae6   : > { %p2946_p10 = scmp.ne.s32.totalorder %s2322_s15, %s2945_s1  ;;  %s3072_s23 = smov [#allocation12]  }
 0xae7   : > { %s2949_s10 = sshll.u32 %s3072_s23, 4  ;;  %s2950_s10 = int_to_ptr.vmem [resolvable:$false] %s2949_s10 }
 0xae8   : > { %p2947_p11 = pnand %p2946_p10, %p3852_p5  ;;  %s2951_s22 = scalar_lea.vmem %s2950_s10, 64 }
 0xae9   : > { %p2952_p2 = scmp.lt.s32.totalorder %s2322_s15, %s2950_s10  ;;  %p2953_p4 = scmp.lt.s32.totalorder %s2951_s22, %s2945_s1 }
 0xaea   : > { %p2948_p7 = pneg %p2947_p11 }
 0xaeb   : > { %p2954_p0 = por %p2953_p4, %p2952_p2 }
 0xaed   : > { %p2955_p13 = pnand %p2954_p0, %p2948_p7 }
 0xaef   : > { %2958 = shalt.err (!%p2955_p13)
}
 0xaf0   : > { %s2959_s30 = scalar_lea.hbm %s3737_s17, 32  ;;  %s2963_s19 = scalar_lea.hbm %s3817_s7, 64 }
 0xaf1   : > { %p2960_p1 = scmp.ne.s32.totalorder %s3737_s17, %s2959_s30  ;;  %p2964_p12 = scmp.lt.u32.totalorder %s3737_s17, %s3817_s7 }
 0xaf2   : > { %p2965_p3 = scmp.lt.u32.totalorder %s2963_s19, %s2959_s30  ;;  %p2967_p10 = scmp.lt.u32.totalorder %s2959_s30, %s3737_s17 }
 0xaf3   : > { %p2961_p6 = pnand %p2960_p1, %p3852_p5 }
 0xaf4   : > { %p2966_p8 = por %p2965_p3, %p2964_p12 }
 0xaf5   : > { %p2962_p9 = pneg %p2961_p6 }
 0xaf6   : > { %p2968_p11 = por %p2967_p10, %p2966_p8 }
 0xaf8   : > { %p2969_p7 = pnand %p2968_p11, %p2962_p9 }
 0xafa   : > { %2972 = shalt.err (!%p2969_p7)
}
 0xafb   : > { %2683 = dma.vmem_to_hbm [thread:$0]  (%p3852_p5), %s2322_s15, 32, %s3737_s17, %s2263_s8  }
 0xafc   : > { %s389_s26 = scalar_lea.vmem [#allocation11], %s2539_s9  ;;  %s2610_s18 = sshll.u32 %s3137_s28, 9 }
 0xafd   : > { %s2304_s14 = sshll.u32 %s389_s26, 4  ;;  %s3766_s29 = scalar_lea.hbm %s3816_s6, %s2610_s18  ;;  %s3761_s14 = int_to_ptr.vmem [resolvable:$true] %s2304_s14 }
 0xafe   : > { %s2973_s9 = scalar_lea.vmem %s3761_s14, 512  ;;  %s3073_s28 = smov [#allocation11]  }
 0xaff   : > { %p2974_p2 = scmp.ne.s32.totalorder %s3761_s14, %s2973_s9  ;;  %s2977_s15 = sshll.u32 %s3073_s28, 4  ;;  %s2978_s15 = int_to_ptr.vmem [resolvable:$false] %s2977_s15 }
 0xb00   : > { %s2979_s8 = scalar_lea.vmem %s2978_s15, 1024  ;;  %p2980_p13 = scmp.lt.s32.totalorder %s3761_s14, %s2978_s15 }
 0xb01   : > { %p2975_p4 = pnand %p2974_p2, %p3852_p5  ;;  %p2981_p1 = scmp.lt.s32.totalorder %s2979_s8, %s2973_s9 }
 0xb03   : > { %p2976_p0 = pneg %p2975_p4  ;;  %p2982_p6 = por %p2981_p1, %p2980_p13 }
 0xb05   : > { %p2983_p9 = pnand %p2982_p6, %p2976_p0 }
 0xb79   : > { %v1795_v1 = vpop.f32.mrb[4].mxu0 }
 0xb7a   : > { %v1797_v51 = vpop.f32.mrb[5].mxu0 }
 0xb7d   : > { %v1877_v50 = vpop.f32.mrb[2].mxu0 }
 0xb7e   : > { %v1879_v26 = vpop.f32.mrb[3].mxu0 }
 0xb8d   : > { %v2213_v4 = vpop.f32.mrb[2].mxu1 }
 0xb8e   : > { %v2638_v39 = vadd.f32 %v2213_v4, %v1877_v50  ;;  %v2215_v44 = vpop.f32.mrb[3].mxu1 }
 0xb8f   : > { %v2639_v53 = vadd.f32 %v2215_v44, %v1879_v26 }
 0xb90   : > { %2225 = vst [vmem:[%s389_s26] sm:$0xff] %v2638_v39 }
 0xb91   : > { %2226 = vst [vmem:[%s389_s26 + $0x8] sm:$0xff] %v2639_v53  ;;  %v2220_v9 = vpop.f32.mrb[0].mxu1 }
 0xb92   : > { %v2640_v10 = vadd.f32 %v2220_v9, %v1795_v1  ;;  %v2222_v43 = vpop.f32.mrb[1].mxu1 }
 0xb93   : > { %v2641_v3 = vadd.f32 %v2222_v43, %v1797_v51 }
 0xb94   : > { %2227 = vst [vmem:[%s389_s26 + $0x10] sm:$0xff] %v2640_v10 }
 0xb95   : > { %2228 = vst [vmem:[%s389_s26 + $0x18] sm:$0xff] %v2641_v3 }
 0xb96   : > { %2986 = shalt.err (!%p2983_p9)
}
 0xb97   : > { %s2987_s1 = scalar_lea.hbm %s3766_s29, 512  ;;  %s2991_s22 = scalar_lea.hbm %s3816_s6, 1024 }
 0xb98   : > { %p2988_p12 = scmp.ne.s32.totalorder %s3766_s29, %s2987_s1  ;;  %p2992_p10 = scmp.lt.u32.totalorder %s3766_s29, %s3816_s6 }
 0xb99   : > { %p2993_p11 = scmp.lt.u32.totalorder %s2991_s22, %s2987_s1  ;;  %p2995_p2 = scmp.lt.u32.totalorder %s2987_s1, %s3766_s29 }
 0xb9a   : > { %p2989_p3 = pnand %p2988_p12, %p3852_p5 }
 0xb9b   : > { %p2994_p7 = por %p2993_p11, %p2992_p10 }
 0xb9c   : > { %p2990_p8 = pneg %p2989_p3 }
 0xb9d   : > { %p2996_p4 = por %p2995_p2, %p2994_p7 }
 0xb9f   : > { %p2997_p0 = pnand %p2996_p4, %p2990_p8 }
 0xba1   : > { %3000 = shalt.err (!%p2997_p0)
}
 0xba2   : > { %s3074_s16 = smov 256   ;;  %s3075_s19 = smov 16  }
 0xba3   : > { %2682 = dma.vmem_to_hbm [thread:$0]  (%p3852_p5), %s3761_s14, 512, %s3766_s29, %s3685_s11, %s3074_s16, %s3074_s16, %s3075_s19  }
 0xba4 PF: > { %s3853_s21 = sld [smem:[#allocation23_spill]]  ;;  %s3854_s13 = sld [smem:[#allocation20_spill]] }
 0xba5   : > { %s2333_s26 = sand.u32 1, %s3039_s24  }
 0xba6   : > { %s2334_s18 = scalar_lea.sflag [#allocation4], %s2333_s26 }
 0xbaa   : > { %p3855_p13 = scmp.ne.s32.totalorder %s3853_s21, 0  ;;  %p3856_p1 = scmp.ge.s32.totalorder %s3854_s13, 2 }
 0xbac   : > { %p2699_p6 = pnand %p3856_p1, %p3855_p13 }
 0xbae   : > { %3026 = dma.done.wait (!%p2699_p6), %s2334_s18, 32  }
 0xbaf   : > { %3028 = vsyncadd (!%p2699_p6), %s2334_s18, 4294967264  ;;  %s3857_s20 = sadd.s32 4294967294, %s3854_s13  }
 0xbb0   : > { %s2342_s17 = sand.u32 1, %s3857_s20  }
 0xbb1   : > { %s2343_s9 = scalar_lea.sflag [#allocation10], %s2342_s17 }
 0xbb2   : > { %3030 = dma.done.wait (!%p2699_p6), %s2343_s9, 640  }
 0xbb3   : > { %3032 = vsyncadd (!%p2699_p6), %s2343_s9, 4294966656  ;;  %s2361_s28 = scalar_lea.sflag [#allocation13], %s2333_s26 }
 0xbb4   : > { %3034 = dma.done.wait (!%p2699_p6), %s2361_s28, 32  }
 0xbb5   : > { %3036 = vsyncadd (!%p2699_p6), %s2361_s28, 4294967264  ;;  %s3858_s27 = sld [smem:[#allocation21_spill]]  ;;  %s3859_s12 = sld [smem:[#allocation19_spill]] }
 0xbb6   : > { %s3860_s26 = sld [smem:[#allocation22_spill]]  ;;  %s3861_s24 = smov %s3043_s25 }
 0xbbb   : > { %p30_p5 = scmp.ge.s32.totalorder %s3858_s27, 4   ;;  %s3862_s25 = smov %s3859_s12 }
 0xbbd   :  { %32 = sbr.rel (!%p30_p5) target bundleno = 13 (0xd), region = 158 }
 0xbc4   :  { %2366 = vsyncpa [#allocation3], 1 }
 0xbc5   :  { %2368 = vsyncpa [#allocation3 + $0x1], 1 }
 0xbc6   :  { %2369 = vsyncpa [#allocation6], 1 }
 0xbc7   :  { %2371 = vsyncpa [#allocation6 + $0x1], 1 }
 0xbc8   :  { %2372 = vsyncpa [#allocation4], 1 }
 0xbc9   :  { %2374 = vsyncpa [#allocation4 + $0x1], 1 }
 0xbca   :  { %2375 = vsyncpa [#allocation10], 1 }
 0xbcb   :  { %2377 = vsyncpa [#allocation10 + $0x1], 1 }
 0xbcc   :  { %2378 = vsyncpa [#allocation13], 1 }
 0xbcd   :  { %2380 = vsyncpa [#allocation13 + $0x1], 1 }

</bundles_post_ra>
